<compile_context>
chip_gen: v7x
topology: tpu7x:2x2x1
jax: 0.10.0
libtpu: 0.0.40
codegen_flags: <defaults>
</compile_context>

<pallas_src>
import functools

import jax
import jax.numpy as jnp
from jax import lax
from jax.experimental import pallas as pl
from jax.experimental.pallas import tpu as pltpu


_NEG_BIG = -1e30   # finite "-inf": keeps the online logsumexp NaN-free


# ---------------------------------------------------------------------------
# Kernels
# ---------------------------------------------------------------------------

def _pooler_kernel(x_ref, wp_ref, bp_ref, pooled_ref):
    """pooled = tanh(hs[0] @ Wp^T + bp) for one batch tile -> (tb, H)."""
    x = x_ref[0]                                             # (tb, H)
    p = lax.dot_general(x, wp_ref[...], (((1,), (1,)), ((), ())),
                        preferred_element_type=jnp.float32)
    pooled_ref[...] = jnp.tanh(
        p + bp_ref[...].astype(jnp.float32)).astype(pooled_ref.dtype)


def _classifier_kernel(pooled_ref, wc_ref, logits_ref):
    """One (tb, tc) logits tile = pooled @ Wc^T.  No cross-tile state."""
    logits_ref[...] = lax.dot_general(
        pooled_ref[...], wc_ref[...], (((1,), (1,)), ((), ())),
        preferred_element_type=jnp.float32).astype(logits_ref.dtype)


def _loss_kernel(x_ref, wp_ref, bp_ref, wc_ref, lbl_ref, loss_ref,
                 pooled_t_sc, m_sc, s_sc, t_sc, *, num_classes, mask_padding):
    c = pl.program_id(1)
    tc = wc_ref.shape[0]                                     # static C tile

    @pl.when(c == 0)
    def _():
        # pooled^T = tanh(Wp @ hs[0]^T + bp) -> (H, tb).  Batch lives on the
        # lane axis so the classifier matmul below is a native (tc,H)@(H,tb)
        # and the running stats / labels / loss stay lane-dense.
        x = x_ref[0]                                         # (tb, H)
        pt = lax.dot_general(wp_ref[...], x, (((1,), (1,)), ((), ())),
                             preferred_element_type=jnp.float32)
        pt = jnp.tanh(pt + bp_ref[...].astype(jnp.float32))  # bp: (H, 1)
        pooled_t_sc[...] = pt.astype(pooled_t_sc.dtype)
        m_sc[...] = jnp.full_like(m_sc, _NEG_BIG)
        s_sc[...] = jnp.zeros_like(s_sc)
        t_sc[...] = jnp.zeros_like(t_sc)

    # (tc, tb) classifier tile, f32 MXU accumulation.
    logits_t = lax.dot_general(wc_ref[...], pooled_t_sc[...],
                               (((1,), (0,)), ((), ())),
                               preferred_element_type=jnp.float32)

    cls_idx = lax.broadcasted_iota(jnp.int32, logits_t.shape, 0) + c * tc
    if mask_padding:
        # Classes past num_classes (partial last wc tile -> garbage rows) must
        # not contribute to the logsumexp.  Finite fill keeps exp() NaN-free.
        logits_t = jnp.where(cls_idx < num_classes, logits_t, _NEG_BIG)

    # Online logsumexp across C tiles.
    m_prev = m_sc[...]                                       # (1, tb)
    m_new = jnp.maximum(m_prev, jnp.max(logits_t, axis=0, keepdims=True))
    alpha = jnp.exp(m_prev - m_new)
    s_sc[...] = alpha * s_sc[...] + jnp.sum(jnp.exp(logits_t - m_new),
                                            axis=0, keepdims=True)
    m_sc[...] = m_new

    # Target-logit accumulation (GLOBAL class indices).
    lbl = lbl_ref[0]                                         # (1, tb)
    t_sc[...] += jnp.sum(jnp.where(cls_idx == lbl, logits_t, 0.0),
                         axis=0, keepdims=True)

    @pl.when(c == pl.num_programs(1) - 1)
    def _():
        loss_ref[0] = (m_sc[...] + jnp.log(s_sc[...])
                       - t_sc[...]).astype(loss_ref.dtype)


# ---------------------------------------------------------------------------
# Tiling / VMEM helpers
# ---------------------------------------------------------------------------

def _round_up(x, m):
    return ((x + m - 1) // m) * m


def _physical_vmem_bytes():
    try:
        cap = getattr(pltpu.get_tpu_info(), "vmem_capacity_bytes", None)
        if cap:
            return int(cap)
    except Exception:
        pass
    return 64 * 1024 * 1024          # conservative default (v7x per-TC VMEM)


def _num_tensorcores():
    try:
        return max(1, int(getattr(jax.devices()[0], "num_cores", 1)))
    except Exception:
        return 1


def _vmem_limit(est_bytes, phys_bytes):
    # Never below the scoped default (32 MiB), never above 90% of physical.
    return int(min(0.9 * phys_bytes, max(1.5 * est_bytes, 32 << 20)))


def _pick_batch_tile(b, cap):
    """Largest divisor of b <= cap that is 128- (preferred) or 8-aligned."""
    cap = max(1, int(cap))
    if b <= cap:
        return b
    for align in (128, 8):
        t = (cap // align) * align
        while t >= align:
            if b % t == 0:
                return t
            t -= align
    # TODO(synk): pad the batch instead of falling back to tb=B for large,
    # non-8-divisible batch sizes (could exceed the VMEM budget).
    return b


def _const_spec(shape, index_map):
    """Single-buffered spec for grid-invariant blocks (saves VMEM)."""
    try:
        return pl.BlockSpec(shape, index_map, pipeline_mode=pl.Buffered(1))
    except (TypeError, AttributeError):
        return pl.BlockSpec(shape, index_map)


def _select_tiles(B, H, C, it_in, it_out, budget, tile_b, tile_c, shards,
                  loss_path):
    """Pick (tb, tc) from the VMEM budget; prefer nb == ceil(B/shards)."""
    tc = min(_round_up(max(int(tile_c), 128), 128), _round_up(C, 128))
    target_tb = B if shards <= 1 else max(8, -(-B // shards))

    def max_tb(tc_):
        if loss_path:
            fixed = (H * H + 128 * H + 2 * tc_ * H) * it_in + (2 << 20)
            per = 3 * H * it_in + 256           # x (x2) + pooled^T + stats
        else:
            fixed = 2 * tc_ * H * it_in + (2 << 20)
            per = 2 * H * it_in + 2 * tc_ * it_out
        return (budget - fixed) // per if budget > fixed else 0

    # A batch tile covering the whole (per-core) batch means the classifier
    # weight streams from HBM exactly once: shrink tc before starving tb.
    while max_tb(tc) < target_tb and tc > 256:
        tc = max(256, _round_up(tc // 2, 128))
    if tc >= C:
        tc = C                                  # single full-extent C tile
    cap = min(max_tb(tc), target_tb)
    if tile_b is not None:
        cap = min(cap, max(8, int(tile_b)))
    tb = _pick_batch_tile(B, max(8, cap))
    return tb, tc


# ---------------------------------------------------------------------------
# Wrapper
# ---------------------------------------------------------------------------

def vit_cls_forward(hidden_states, params, labels=None, *,
                    compute_dtype=jnp.bfloat16, tile_b=None, tile_c=2048,
                    batch_shards=None):
    """Forward of `ViTCls_` on a single TP rank.

    hidden_states: [S, B, H] (Megatron sequence-first layout).
    params: {"pooler_w": [H, H], "pooler_b": [H] or [1, H], "cls_w": [C, H]}
            (PyTorch (out_features, in_features) weight layout).
    labels: [B] integer class ids, or None.
    compute_dtype: operand dtype streamed from HBM (bf16 default == the
            module's half_entropy=True; use jnp.float32 for entropy_in_fp32).
            Accumulation and softmax math are always f32.

    Returns logits_parallel [1, B, C] (in hidden_states' original dtype) if
    labels is None, else per-example loss [B, 1] in f32.
    """
    S, B, H = hidden_states.shape
    orig_dtype = hidden_states.dtype
    wp = jnp.asarray(params["pooler_w"])
    bp = jnp.asarray(params["pooler_b"]).reshape(-1)
    wc = jnp.asarray(params["cls_w"])
    C = wc.shape[0]

    if compute_dtype is not None:
        hidden_states = hidden_states.astype(compute_dtype)
        wp = wp.astype(compute_dtype)
        bp = bp.astype(compute_dtype)
        wc = wc.astype(compute_dtype)
    cdt = wc.dtype
    it_in = jnp.dtype(cdt).itemsize
    it_out = jnp.dtype(orig_dtype).itemsize

    phys = _physical_vmem_bytes()
    budget = int(phys * 0.9)
    ncores = _num_tensorcores() if batch_shards is None else int(batch_shards)

    # ------------------------------------------------------------------ #
    # labels is None: pooler (small) then classifier with both axes       #
    # parallel (megacore shards the C axis even when nb == 1).            #
    # ------------------------------------------------------------------ #
    if labels is None:
        fixed_p = (H * H + 128 * H) * it_in + (2 << 20)
        per_p = 4 * H * it_in + 8
        cap_p = (budget - fixed_p) // per_p if budget > fixed_p else 8
        if tile_b is not None:
            cap_p = min(cap_p, max(8, int(tile_b)))
        tb_p = _pick_batch_tile(B, max(8, cap_p))
        nb_p = B // tb_p

        pooled = pl.pallas_call(
            _pooler_kernel,
            grid=(nb_p,),
            in_specs=[pl.BlockSpec((1, tb_p, H), lambda i: (0, i, 0)),
                      _const_spec((H, H), lambda i: (0, 0)),
                      _const_spec((1, H), lambda i: (0, 0))],
            out_specs=pl.BlockSpec((tb_p, H), lambda i: (i, 0)),
            out_shape=jax.ShapeDtypeStruct((B, H), cdt),
            compiler_params=pltpu.CompilerParams(
                dimension_semantics=("parallel",),
                vmem_limit_bytes=_vmem_limit(fixed_p + per_p * tb_p, phys)),
            cost_estimate=pl.CostEstimate(
                flops=int(2 * B * H * H), transcendentals=int(B * H),
                bytes_accessed=int((2 * B * H + H * H) * it_in)),
        )(hidden_states, wp, bp.reshape(1, H))

        tb, tc = _select_tiles(B, H, C, it_in, it_out, budget, tile_b, tile_c,
                               1, loss_path=False)
        nb, nc = B // tb, pl.cdiv(C, tc)
        est = (2 * tc * H * it_in + tb * (2 * H * it_in + 2 * tc * it_out)
               + (2 << 20))
        # Output is written unpadded (partial edge C blocks are masked by
        # Pallas) -> no wc pad copy and no logits slice copy in the wrapper.
        logits = pl.pallas_call(
            _classifier_kernel,
            grid=(nb, nc),
            in_specs=[pl.BlockSpec((tb, H), lambda i, c: (i, 0)),
                      pl.BlockSpec((tc, H), lambda i, c: (c, 0))],
            out_specs=pl.BlockSpec((tb, tc), lambda i, c: (i, c)),
            out_shape=jax.ShapeDtypeStruct((B, C), orig_dtype),
            compiler_params=pltpu.CompilerParams(
                dimension_semantics=("parallel", "parallel"),
                vmem_limit_bytes=_vmem_limit(est, phys)),
            cost_estimate=pl.CostEstimate(
                flops=int(2 * B * C * H), transcendentals=0,
                bytes_accessed=int(nb * C * H * it_in + B * H * it_in
                                   + B * C * it_out)),
        )(pooled, wc)
        return logits[None]                     # unsqueeze(0) -> [1, B, C]

    # ------------------------------------------------------------------ #
    # Training path: fused pooler + classifier + online-logsumexp CE.     #
    # ------------------------------------------------------------------ #
    lbl = jnp.asarray(labels).reshape(-1).astype(jnp.int32)

    # Only shard the batch across TensorCores when each shard is still big
    # enough to stay compute-bound (otherwise nb==1 minimizes the wc stream).
    shards = ncores if (ncores > 1 and B >= 512 * ncores) else 1
    tb, tc = _select_tiles(B, H, C, it_in, 4, budget, tile_b, tile_c,
                           shards, loss_path=True)
    nb, nc = B // tb, pl.cdiv(C, tc)
    mask_padding = (nc * tc != C)

    est = ((H * H + 128 * H + 2 * tc * H) * it_in
           + tb * (3 * H * it_in + 256) + (2 << 20))

    kernel = functools.partial(_loss_kernel, num_classes=C,
                               mask_padding=mask_padding)
    loss = pl.pallas_call(
        kernel,
        grid=(nb, nc),
        in_specs=[pl.BlockSpec((1, tb, H), lambda i, c: (0, i, 0)),
                  _const_spec((H, H), lambda i, c: (0, 0)),
                  _const_spec((H, 1), lambda i, c: (0, 0)),
                  pl.BlockSpec((tc, H), lambda i, c: (c, 0)),
                  pl.BlockSpec((1, 1, tb), lambda i, c: (i, 0, 0))],
        out_specs=pl.BlockSpec((1, 1, tb), lambda i, c: (i, 0, 0)),
        out_shape=jax.ShapeDtypeStruct((nb, 1, tb), jnp.float32),
        scratch_shapes=[pltpu.VMEM((H, tb), cdt),          # pooled^T
                        pltpu.VMEM((1, tb), jnp.float32),  # running max
                        pltpu.VMEM((1, tb), jnp.float32),  # running sum(exp)
                        pltpu.VMEM((1, tb), jnp.float32)], # target logit
        compiler_params=pltpu.CompilerParams(
            dimension_semantics=("parallel", "arbitrary"),
            vmem_limit_bytes=_vmem_limit(est, phys)),
        cost_estimate=pl.CostEstimate(
            flops=int(2 * B * H * H + 2 * B * nc * tc * H),
            transcendentals=int(B * (H + nc * tc)),
            bytes_accessed=int((B * H + H * H + nb * C * H) * it_in + 8 * B)),
    )(hidden_states, wp, bp.reshape(H, 1), wc, lbl.reshape(nb, 1, tb))

    # ([1, B] per-example CE).transpose(0, 1) -> [B, 1]
    return loss.reshape(B, 1)


# ---------------------------------------------------------------------------
# Reference + self-test
# ---------------------------------------------------------------------------

def _reference(hidden_states, params, labels):
    x = hidden_states[0].astype(jnp.float32)
    wp = jnp.asarray(params["pooler_w"]).astype(jnp.float32)
    bp = jnp.asarray(params["pooler_b"]).reshape(1, -1).astype(jnp.float32)
    wc = jnp.asarray(params["cls_w"]).astype(jnp.float32)
    pooled = jnp.tanh(x @ wp.T + bp)
    logits = pooled @ wc.T
    lse = jax.scipy.special.logsumexp(logits, axis=-1)
    tgt = jnp.take_along_axis(logits, labels[:, None], axis=-1)[:, 0]
    return logits, (lse - tgt)[:, None]


if __name__ == "__main__":
    S, B, H, C = 8, 16, 128, 512
    ks = jax.random.split(jax.random.PRNGKey(0), 10)

    hidden_states = jax.random.normal(ks[0], (S, B, H), dtype=jnp.float32)
    params = {
        "pooler_w": jax.random.normal(ks[1], (H, H), dtype=jnp.float32) * 0.05,
        "pooler_b": jax.random.normal(ks[2], (1, H), dtype=jnp.float32) * 0.05,
        "cls_w":    jax.random.normal(ks[3], (C, H), dtype=jnp.float32) * 0.05,
    }
    labels = jax.random.randint(ks[4], (B,), 0, C, dtype=jnp.int32)
    ref_logits, ref_loss = _reference(hidden_states, params, labels)

    # 1) f32 operands, small tiles -> grid (2, 4): exercises batch tiling and
    #    the online logsumexp across classifier tiles.  Strict tolerances.
    loss = jax.block_until_ready(vit_cls_forward(
        hidden_states, params, labels,
        compute_dtype=jnp.float32, tile_b=8, tile_c=128))
    logits = jax.block_until_ready(vit_cls_forward(
        hidden_states, params, None,
        compute_dtype=jnp.float32, tile_b=8, tile_c=128))
    assert loss.shape == (B, 1), loss.shape
    assert logits.shape == (1, B, C), logits.shape
    assert jnp.allclose(logits[0], ref_logits, atol=2e-2, rtol=2e-2), (
        float(jnp.max(jnp.abs(logits[0] - ref_logits))))
    assert jnp.allclose(loss, ref_loss, atol=3e-2, rtol=0), (
        float(jnp.max(jnp.abs(loss - ref_loss))))

    # 2) Defaults: bf16 operand streaming, auto VMEM-derived tiles (nb == 1,
    #    classifier weight read once).  Looser tolerances (half_entropy-style).
    loss_bf = jax.block_until_ready(vit_cls_forward(hidden_states, params,
                                                    labels))
    logits_bf = jax.block_until_ready(vit_cls_forward(hidden_states, params,
                                                      None))
    assert loss_bf.shape == (B, 1) and bool(jnp.all(jnp.isfinite(loss_bf)))
    assert logits_bf.shape == (1, B, C)
    assert logits_bf.dtype == hidden_states.dtype   # logits keep original dtype
    assert float(jnp.max(jnp.abs(loss_bf - ref_loss))) < 0.2
    assert float(jnp.max(jnp.abs(logits_bf[0] - ref_logits))) < 0.1

    # 3) C not a multiple of 128 (partial classifier tiles, masked classes).
    C2 = 200
    params2 = dict(params, cls_w=jax.random.normal(
        ks[5], (C2, H), dtype=jnp.float32) * 0.05)
    labels2 = jax.random.randint(ks[6], (B,), 0, C2, dtype=jnp.int32)
    ref_logits2, ref_loss2 = _reference(hidden_states, params2, labels2)
    loss2 = jax.block_until_ready(vit_cls_forward(
        hidden_states, params2, labels2,
        compute_dtype=jnp.float32, tile_b=8, tile_c=128))
    logits2 = jax.block_until_ready(vit_cls_forward(
        hidden_states, params2, None,
        compute_dtype=jnp.float32, tile_b=8, tile_c=128))
    assert logits2.shape == (1, B, C2), logits2.shape
    assert jnp.allclose(logits2[0], ref_logits2, atol=2e-2, rtol=2e-2)
    assert jnp.allclose(loss2, ref_loss2, atol=3e-2, rtol=0)

    # 4) Tiny class count (C < 128): single full-extent classifier tile.
    C3 = 10
    params3 = dict(params, cls_w=jax.random.normal(
        ks[7], (C3, H), dtype=jnp.float32) * 0.05)
    labels3 = jax.random.randint(ks[8], (B,), 0, C3, dtype=jnp.int32)
    ref_logits3, ref_loss3 = _reference(hidden_states, params3, labels3)
    loss3 = jax.block_until_ready(vit_cls_forward(
        hidden_states, params3, labels3, compute_dtype=jnp.float32))
    logits3 = jax.block_until_ready(vit_cls_forward(
        hidden_states, params3, None, compute_dtype=jnp.float32))
    assert logits3.shape == (1, B, C3), logits3.shape
    assert jnp.allclose(logits3[0], ref_logits3, atol=2e-2, rtol=2e-2)
    assert jnp.allclose(loss3, ref_loss3, atol=3e-2, rtol=0)

    print("KERNEL_OK")
</pallas_src>

<mosaic_0001>
module attributes {stable_mosaic.version = 11 : i64} {
  func.func @_loss_kernel(%arg0: i32, %arg1: i32, %arg2: memref<1x8x128xf32, #tpu.memory_space<vmem>>, %arg3: memref<128x128xf32, #tpu.memory_space<vmem>>, %arg4: memref<128x1xf32, #tpu.memory_space<vmem>>, %arg5: memref<128x128xf32, #tpu.memory_space<vmem>>, %arg6: memref<1x1x8xi32, #tpu.memory_space<vmem>>, %arg7: memref<1x1x8xf32, #tpu.memory_space<vmem>>, %arg8: memref<128x8xf32, #tpu.memory_space<vmem>>, %arg9: memref<1x8xf32, #tpu.memory_space<vmem>>, %arg10: memref<1x8xf32, #tpu.memory_space<vmem>>, %arg11: memref<1x8xf32, #tpu.memory_space<vmem>>) attributes {dimension_semantics = [#tpu.dimension_semantics<parallel>, #tpu.dimension_semantics<arbitrary>], iteration_bounds = array<i64: 2, 4>, scalar_prefetch = 0 : i64, scratch_operands = 4 : i64, tpu.core_type = #tpu.core_type<tc>, window_params = [{transform_indices = @transform_0, window_bounds = array<i64: 1, 8, 128>}, {pipeline_mode = #tpu.pipeline_mode<synchronous>, transform_indices = @transform_1, window_bounds = array<i64: 128, 128>}, {pipeline_mode = #tpu.pipeline_mode<synchronous>, transform_indices = @transform_2, window_bounds = array<i64: 128, 1>}, {transform_indices = @transform_3, window_bounds = array<i64: 128, 128>}, {transform_indices = @transform_4, window_bounds = array<i64: 1, 1, 8>}, {transform_indices = @transform_5, window_bounds = array<i64: 1, 1, 8>}]} {
    %c0_i32 = arith.constant 0 : i32
    %0 = arith.cmpi eq, %arg1, %c0_i32 : i32
    %1 = arith.extui %0 : i1 to i32
    %c0_i32_0 = arith.constant 0 : i32
    %2 = arith.cmpi ne, %1, %c0_i32_0 : i32
    scf.if %2 {
      %c0_24 = arith.constant 0 : index
      %c0_25 = arith.constant 0 : index
      %c0_26 = arith.constant 0 : index
      %40 = vector.load %arg2[%c0_24, %c0_25, %c0_26] : memref<1x8x128xf32, #tpu.memory_space<vmem>>, vector<1x8x128xf32>
      %41 = vector.shape_cast %40 : vector<1x8x128xf32> to vector<8x128xf32>
      %c0_27 = arith.constant 0 : index
      %c0_28 = arith.constant 0 : index
      %42 = vector.load %arg3[%c0_27, %c0_28] : memref<128x128xf32, #tpu.memory_space<vmem>>, vector<128x128xf32>
      %cst_29 = arith.constant dense<0.000000e+00> : vector<128x8xf32>
      %43 = tpu.matmul %42, %41, %cst_29 {dimension_numbers = #tpu.dot_dimension_numbers<[1], [1], [0], [0], [0, 0, 1, 0], [], []>} : vector<128x128xf32>, vector<8x128xf32>, vector<128x8xf32> -> vector<128x8xf32>
      %c0_30 = arith.constant 0 : index
      %c0_31 = arith.constant 0 : index
      %44 = vector.load %arg4[%c0_30, %c0_31] : memref<128x1xf32, #tpu.memory_space<vmem>>, vector<128x1xf32>
      %45 = vector.broadcast %44 : vector<128x1xf32> to vector<128x8xf32>
      %46 = arith.addf %43, %45 : vector<128x8xf32>
      %47 = math.tanh %46 : vector<128x8xf32>
      %c0_32 = arith.constant 0 : index
      %c0_33 = arith.constant 0 : index
      %48 = vector.load %arg8[%c0_32, %c0_33] : memref<128x8xf32, #tpu.memory_space<vmem>>, vector<128x8xf32>
      tpu.vector_store %arg8[%c0_32, %c0_33], %47 {strides = array<i32>} : memref<128x8xf32, #tpu.memory_space<vmem>>, vector<128x8xf32>,
      %cst_34 = arith.constant -1.000000e+30 : f32
      %49 = vector.broadcast %cst_34 : f32 to vector<1x8xf32>
      %c0_35 = arith.constant 0 : index
      %c0_36 = arith.constant 0 : index
      %50 = vector.load %arg9[%c0_35, %c0_36] : memref<1x8xf32, #tpu.memory_space<vmem>>, vector<1x8xf32>
      tpu.vector_store %arg9[%c0_35, %c0_36], %49 {strides = array<i32>} : memref<1x8xf32, #tpu.memory_space<vmem>>, vector<1x8xf32>,
      %cst_37 = arith.constant 0.000000e+00 : f32
      %51 = vector.broadcast %cst_37 : f32 to vector<1x8xf32>
      %c0_38 = arith.constant 0 : index
      %c0_39 = arith.constant 0 : index
      %52 = vector.load %arg10[%c0_38, %c0_39] : memref<1x8xf32, #tpu.memory_space<vmem>>, vector<1x8xf32>
      tpu.vector_store %arg10[%c0_38, %c0_39], %51 {strides = array<i32>} : memref<1x8xf32, #tpu.memory_space<vmem>>, vector<1x8xf32>,
      %cst_40 = arith.constant 0.000000e+00 : f32
      %53 = vector.broadcast %cst_40 : f32 to vector<1x8xf32>
      %c0_41 = arith.constant 0 : index
      %c0_42 = arith.constant 0 : index
      %54 = vector.load %arg11[%c0_41, %c0_42] : memref<1x8xf32, #tpu.memory_space<vmem>>, vector<1x8xf32>
      tpu.vector_store %arg11[%c0_41, %c0_42], %53 {strides = array<i32>} : memref<1x8xf32, #tpu.memory_space<vmem>>, vector<1x8xf32>,
    } else {
    }
    %c0 = arith.constant 0 : index
    %c0_1 = arith.constant 0 : index
    %3 = vector.load %arg5[%c0, %c0_1] : memref<128x128xf32, #tpu.memory_space<vmem>>, vector<128x128xf32>
    %c0_2 = arith.constant 0 : index
    %c0_3 = arith.constant 0 : index
    %4 = vector.load %arg8[%c0_2, %c0_3] : memref<128x8xf32, #tpu.memory_space<vmem>>, vector<128x8xf32>
    %cst = arith.constant dense<0.000000e+00> : vector<128x8xf32>
    %5 = tpu.matmul %3, %4, %cst {dimension_numbers = #tpu.dot_dimension_numbers<[1], [0], [0], [1], [0, 0, 1, 1], [], []>} : vector<128x128xf32>, vector<128x8xf32>, vector<128x8xf32> -> vector<128x8xf32>
    %6 = tpu.iota {dimensions = array<i32: 0>} : vector<128x8xi32>
    %c128_i32 = arith.constant 128 : i32
    %7 = arith.muli %arg1, %c128_i32 : i32
    %8 = vector.broadcast %7 : i32 to vector<128x8xi32>
    %9 = arith.addi %6, %8 : vector<128x8xi32>
    %c0_4 = arith.constant 0 : index
    %c0_5 = arith.constant 0 : index
    %10 = vector.load %arg9[%c0_4, %c0_5] : memref<1x8xf32, #tpu.memory_space<vmem>>, vector<1x8xf32>
    %cst_6 = arith.constant dense<0xFF800000> : vector<8xf32>
    %11 = vector.multi_reduction <maximumf>, %5, %cst_6 [0] : vector<128x8xf32> to vector<8xf32>
    %12 = vector.shape_cast %11 : vector<8xf32> to vector<1x8xf32>
    %13 = arith.maximumf %10, %12 : vector<1x8xf32>
    %14 = arith.subf %10, %13 : vector<1x8xf32>
    %15 = math.exp %14 : vector<1x8xf32>
    %c0_7 = arith.constant 0 : index
    %c0_8 = arith.constant 0 : index
    %16 = vector.load %arg10[%c0_7, %c0_8] : memref<1x8xf32, #tpu.memory_space<vmem>>, vector<1x8xf32>
    %17 = arith.mulf %15, %16 : vector<1x8xf32>
    %18 = vector.broadcast %13 : vector<1x8xf32> to vector<128x8xf32>
    %19 = arith.subf %5, %18 : vector<128x8xf32>
    %20 = math.exp %19 : vector<128x8xf32>
    %cst_9 = arith.constant dense<0.000000e+00> : vector<8xf32>
    %21 = vector.multi_reduction <add>, %20, %cst_9 [0] : vector<128x8xf32> to vector<8xf32>
    %22 = vector.shape_cast %21 : vector<8xf32> to vector<1x8xf32>
    %23 = arith.addf %17, %22 : vector<1x8xf32>
    %c0_10 = arith.constant 0 : index
    %c0_11 = arith.constant 0 : index
    %24 = vector.load %arg10[%c0_10, %c0_11] : memref<1x8xf32, #tpu.memory_space<vmem>>, vector<1x8xf32>
    tpu.vector_store %arg10[%c0_10, %c0_11], %23 {strides = array<i32>} : memref<1x8xf32, #tpu.memory_space<vmem>>, vector<1x8xf32>,
    %c0_12 = arith.constant 0 : index
    %c0_13 = arith.constant 0 : index
    %25 = vector.load %arg9[%c0_12, %c0_13] : memref<1x8xf32, #tpu.memory_space<vmem>>, vector<1x8xf32>
    tpu.vector_store %arg9[%c0_12, %c0_13], %13 {strides = array<i32>} : memref<1x8xf32, #tpu.memory_space<vmem>>, vector<1x8xf32>,
    %c0_14 = arith.constant 0 : index
    %c0_15 = arith.constant 0 : index
    %c0_16 = arith.constant 0 : index
    %26 = vector.load %arg6[%c0_14, %c0_15, %c0_16] : memref<1x1x8xi32, #tpu.memory_space<vmem>>, vector<1x1x8xi32>
    %27 = vector.shape_cast %26 : vector<1x1x8xi32> to vector<1x8xi32>
    %c0_17 = arith.constant 0 : index
    %c0_18 = arith.constant 0 : index
    %28 = vector.load %arg11[%c0_17, %c0_18] : memref<1x8xf32, #tpu.memory_space<vmem>>, vector<1x8xf32>
    %29 = vector.broadcast %27 : vector<1x8xi32> to vector<128x8xi32>
    %30 = arith.cmpi eq, %9, %29 : vector<128x8xi32>
    %cst_19 = arith.constant 0.000000e+00 : f32
    %31 = vector.broadcast %cst_19 : f32 to vector<128x8xf32>
    %32 = arith.select %30, %5, %31 : vector<128x8xi1>, vector<128x8xf32>
    %cst_20 = arith.constant dense<0.000000e+00> : vector<8xf32>
    %33 = vector.multi_reduction <add>, %32, %cst_20 [0] : vector<128x8xf32> to vector<8xf32>
    %34 = vector.shape_cast %33 : vector<8xf32> to vector<1x8xf32>
    %35 = arith.addf %28, %34 : vector<1x8xf32>
    %c0_21 = arith.constant 0 : index
    %c0_22 = arith.constant 0 : index
    %36 = vector.load %arg11[%c0_21, %c0_22] : memref<1x8xf32, #tpu.memory_space<vmem>>, vector<1x8xf32>
    tpu.vector_store %arg11[%c0_21, %c0_22], %35 {strides = array<i32>} : memref<1x8xf32, #tpu.memory_space<vmem>>, vector<1x8xf32>,
    %c3_i32 = arith.constant 3 : i32
    %37 = arith.cmpi eq, %arg1, %c3_i32 : i32
    %38 = arith.extui %37 : i1 to i32
    %c0_i32_23 = arith.constant 0 : i32
    %39 = arith.cmpi ne, %38, %c0_i32_23 : i32
    scf.if %39 {
      %c0_24 = arith.constant 0 : index
      %c0_25 = arith.constant 0 : index
      %40 = vector.load %arg9[%c0_24, %c0_25] : memref<1x8xf32, #tpu.memory_space<vmem>>, vector<1x8xf32>
      %c0_26 = arith.constant 0 : index
      %c0_27 = arith.constant 0 : index
      %41 = vector.load %arg10[%c0_26, %c0_27] : memref<1x8xf32, #tpu.memory_space<vmem>>, vector<1x8xf32>
      %42 = math.log %41 : vector<1x8xf32>
      %43 = arith.addf %40, %42 : vector<1x8xf32>
      %c0_28 = arith.constant 0 : index
      %c0_29 = arith.constant 0 : index
      %44 = vector.load %arg11[%c0_28, %c0_29] : memref<1x8xf32, #tpu.memory_space<vmem>>, vector<1x8xf32>
      %45 = arith.subf %43, %44 : vector<1x8xf32>
      %c0_30 = arith.constant 0 : index
      %c0_31 = arith.constant 0 : index
      %c0_32 = arith.constant 0 : index
      %46 = vector.load %arg7[%c0_30, %c0_31, %c0_32] : memref<1x1x8xf32, #tpu.memory_space<vmem>>, vector<1x1x8xf32>
      %47 = vector.shape_cast %46 : vector<1x1x8xf32> to vector<1x8xf32>
      %48 = vector.shape_cast %45 : vector<1x8xf32> to vector<1x1x8xf32>
      tpu.vector_store %arg7[%c0_30, %c0_31, %c0_32], %48 {strides = array<i32>} : memref<1x1x8xf32, #tpu.memory_space<vmem>>, vector<1x1x8xf32>,
    } else {
    }
    return
  }
  func.func @transform_0(%arg0: i32, %arg1: i32) -> (i32, i32, i32) {
    %c0_i32 = arith.constant 0 : i32
    %c0_i32_0 = arith.constant 0 : i32
    %c0_i32_1 = arith.constant 0 : i32
    return %c0_i32, %arg0, %c0_i32_0 : i32, i32, i32
  }
  func.func @transform_1(%arg0: i32, %arg1: i32) -> (i32, i32) {
    %c0_i32 = arith.constant 0 : i32
    %c0_i32_0 = arith.constant 0 : i32
    %c0_i32_1 = arith.constant 0 : i32
    return %c0_i32, %c0_i32_0 : i32, i32
  }
  func.func @transform_2(%arg0: i32, %arg1: i32) -> (i32, i32) {
    %c0_i32 = arith.constant 0 : i32
    %c0_i32_0 = arith.constant 0 : i32
    %c0_i32_1 = arith.constant 0 : i32
    return %c0_i32, %c0_i32_0 : i32, i32
  }
  func.func @transform_3(%arg0: i32, %arg1: i32) -> (i32, i32) {
    %c0_i32 = arith.constant 0 : i32
    %c0_i32_0 = arith.constant 0 : i32
    return %arg1, %c0_i32 : i32, i32
  }
  func.func @transform_4(%arg0: i32, %arg1: i32) -> (i32, i32, i32) {
    %c0_i32 = arith.constant 0 : i32
    %c0_i32_0 = arith.constant 0 : i32
    %c0_i32_1 = arith.constant 0 : i32
    return %arg0, %c0_i32, %c0_i32_0 : i32, i32, i32
  }
  func.func @transform_5(%arg0: i32, %arg1: i32) -> (i32, i32, i32) {
    %c0_i32 = arith.constant 0 : i32
    %c0_i32_0 = arith.constant 0 : i32
    %c0_i32_1 = arith.constant 0 : i32
    return %arg0, %c0_i32, %c0_i32_0 : i32, i32, i32
  }
}

</mosaic_0001>

<bundles_post_ra>
// kernel: tpu_custom_call.1
= control target key start
LH: loop header
LB: loop body
LE: loop exit
PB: predicated region body
PF: predicated region fallthrough
CT: control target
= control target key end

     0   :  { %s2394_s0 = inlined_call_operand.vmem [shape: f32[8,16,128], index: 0, kind: input, shape index: {}]   ;;  %s2395_s1 = inlined_call_operand.hbm [shape: f32[128,128], index: 1, kind: input, shape index: {}]   ;;  %s2396_s2 = inlined_call_operand.vmem [shape: f32[128,1], index: 2, kind: input, shape index: {}]   ;;  %s2397_s3 = inlined_call_operand.hbm [shape: f32[512,128], index: 3, kind: input, shape index: {}]   ;;  %s2398_s4 = inlined_call_operand.vmem [shape: s32[2,1,8], index: 4, kind: input, shape index: {}]   ;;  %s2399_s5 = inlined_call_operand.hbm [shape: f32[2,1,8], index: 5, kind: output, shape index: {}]  }
   0x1   :  { %2413 = sst [smem:[#allocation20_spill]] %s2395_s1 }
   0x2   :  { %10 = vsyncpa [#allocation7], 0 }
   0x3   :  { %11 = vsyncpa [#allocation10], 0 }
   0x4   :  { %13 = vsyncpa [#allocation10 + $0x1], 0 }
   0x5   :  { %14 = vsyncpa [#allocation8], 0 }
   0x6   :  { %16 = vsyncpa [#allocation8 + $0x1], 0  ;;  %s1777_s18 = smov 0   ;;  %s1779_s19 = smov 0  }
   0x7   :  { %s1781_s20 = smov 0   ;;  %s1783_s21 = smov 0  }
   0x8   :  { %s1785_s22 = smov 0   ;;  %s1787_s23 = smov 0  }
   0x9   :  { %s1789_s24 = smov 0   ;;  %s1791_s25 = smov 0  }
   0xa   :  { %s1793_s26 = smov 0   ;;  %s1795_s27 = smov 0  }
   0xb   :  { %s1797_s28 = smov 0  }
   0xc LB: > { %2414 = sst [smem:[#allocation15_spill]] %s1697_s18  ;;  %s1164_s29 = sadd.s32 4294967295, %s1737_s28   ;;  %s1737_s28 = sphi %s1797_s28, %s22_s28   ;;  %s1733_s27 = sphi %s1795_s27, %s2450_s27   ;;  %s1729_s26 = sphi %s1793_s26, %s2449_s26   ;;  %s1725_s25 = sphi %s1791_s25, %s2448_s25   ;;  %s1721_s24 = sphi %s1789_s24, %s2447_s24   ;;  %s1717_s23 = sphi %s1787_s23, %s2446_s23   ;;  %s1713_s22 = sphi %s1785_s22, %s2445_s22   ;;  %s1709_s21 = sphi %s1783_s21, %s2444_s21   ;;  %s1705_s20 = sphi %s1781_s20, %s2443_s20   ;;  %s1701_s19 = sphi %s1779_s19, %s2442_s19   ;;  %s1697_s18 = sphi %s1777_s18, %s2441_s18  }
   0xd   : > { %2415 = sst [smem:[#allocation16_spill]] %s1737_s28  ;;  %s1165_s30 = sadd.s32 4294967294, %s1737_s28  }
   0xe   : > { %p122_p0 = scmp.ne.s32.totalorder %s1713_s22, %s1709_s21  ;;  %p1833_p1 = scmp.eq.s32.totalorder %s1164_s29, 0 }
   0xf   : > { %p171_p2 = scmp.ne.s32.totalorder %s1705_s20, %s1701_s19  ;;  %p172_p4 = scmp.eq.s32.totalorder %s1164_s29, 7 }
  0x10   : > { %s2416_s6 = scalar_select %p1833_p1, 1, 0 }
  0x11   : > { %p1842_p3 = por %p1833_p1, %p122_p0  ;;  %p177_p5 = scmp.ne.s32.totalorder %s1701_s19, %s1697_s18 }
  0x12   : > { %p178_p6 = scmp.eq.s32.totalorder %s1165_s30, 7  ;;  %p1848_p7 = por %p172_p4, %p171_p2 }
  0x13   : > { %s2417_s8 = scalar_select %p1842_p3, 1, 0 }
  0x14   : > { %s2418_s9 = scalar_select %p1848_p7, 1, 0 }
  0x15   : > { %p1166_p8 = scmp.ge.s32.totalorder %s1737_s28, 1  ;;  %p1853_p9 = por %p178_p6, %p177_p5 }
  0x16   : > { %p185_p10 = scmp.lt.s32.totalorder %s1737_s28, 9  ;;  %s1739_s12 = smov [#allocation6]  }
  0x17   : > { %s2419_s10 = scalar_select %p1853_p9, 1, 0 }
  0x18   : > { %p1858_p11 = pnand %p1166_p8, %p185_p10  ;;  %s197_s13 = sshll.u32 %s1739_s12, 4  ;;  %s198_s13 = int_to_ptr.vmem [resolvable:$true] %s197_s13 }
  0x19   : > { %2420 = sst [smem:[#allocation17_spill]] %s2419_s10  ;;  %s2423_s1 = sld [smem:[#allocation20_spill]] }
  0x1a   : > { %s2421_s11 = scalar_select %p1858_p11, 1, 0 }
  0x1b   : > { %p1373_p12 = pneg %p1858_p11 }
  0x1d   : > { %p1866_p13 = pnand %p1373_p12, %p1833_p1 }
  0x1f   : > { %s1553_s17 = scalar_lea.hbm %s2423_s1, 2048  ;;  %p1555_p2 = pneg %p1866_p13 }
  0x20   : > { %p1554_p0 = scmp.ne.s32.totalorder %s2423_s1, %s1553_s17  ;;  %p1560_p6 = scmp.lt.u32.totalorder %s1553_s17, %s2423_s1 }
  0x22   : > { %p1556_p4 = pnand %p1555_p2, %p1554_p0 }
  0x24   : > { %p1557_p5 = pneg %p1556_p4 }
  0x26   : > { %p1562_p8 = pnand %p1560_p6, %p1557_p5 }
  0x28   : > { %1565 = shalt.err (!%p1562_p8)
}
  0x29   : > { %s1566_s7 = scalar_lea.vmem %s198_s13, 2048  ;;  %p1574_p7 = scmp.lt.s32.totalorder %s198_s13, %s198_s13 }
  0x2a   : > { %p1567_p10 = scmp.ne.s32.totalorder %s198_s13, %s1566_s7  ;;  %p1575_p3 = scmp.lt.s32.totalorder %s1566_s7, %s1566_s7 }
  0x2c   : > { %p1569_p12 = pnand %p1567_p10, %p1555_p2  ;;  %p1576_p1 = por %p1575_p3, %p1574_p7 }
  0x2e   : > { %p1570_p9 = pneg %p1569_p12 }
  0x30   : > { %p1577_p11 = pnand %p1576_p1, %p1570_p9 }
  0x32   : > { %1580 = shalt.err (!%p1577_p11)
}
  0x33   : > { %s2405_s15 = smov 128   ;;  %s2406_s16 = smov 8  }
  0x34   : > { %1376 = dma.hbm_to_vmem [thread:$0]  (!%p1866_p13), %s2423_s1, 2048, %s198_s13, [#allocation7], %s2405_s15, %s2405_s15, %s2406_s16  }
  0x35   : > { %s31_s21 = sadd.s32 1, %s1729_s26  ;;  %s34_s29 = sadd.s32 1, %s1733_s27 }
  0x36   : > { %p32_p1 = scmp.ge.s32.totalorder %s31_s21, 4  ;;  %s109_s30 = sadd.s32 1, %s1717_s23 }
  0x37   : > { %p116_p3 = scmp.ne.s32.totalorder %s1717_s23, %s1713_s22  ;;  %p117_p7 = scmp.eq.s32.totalorder %s1737_s28, 0 }
  0x38   : > { %s2452_s21 = smov (%p32_p1, %s31_s21), 0  ;;  %s2454_s29 = smov (!%p32_p1, %s34_s29), %s1733_s27 }
  0x39   : > { %2424 = sst [smem:[#allocation18_spill]] %s2452_s21  ;;  %s106_s14 = ssub.s32 %s1729_s26, %s2452_s21 }
  0x3a   : > { %p36_p9 = scmp.ge.s32.totalorder %s2454_s29, 2  ;;  %p107_p11 = scmp.eq.s32.totalorder %s106_s14, 0 }
  0x3b   : > { %p1900_p0 = por %p117_p7, %p116_p3  ;;  %p1386_p13 = scmp.lt.s32.totalorder %s1737_s28, 8 }
  0x3c   : > { %s2456_s29 = smov (%p36_p9, %s2454_s29), 0  ;;  %s221_s17 = sand.u32 1, %s1717_s23  }
  0x3d   : > { %2426 = sst [smem:[#allocation19_spill]] %s2456_s29  ;;  %s158_s7 = ssub.s32 %s1733_s27, %s2456_s29 }
  0x3e   : > { %s1908_s12 = scalar_select %p107_p11, %s1717_s23, %s109_s30  }
  0x3f   : > { %p159_p2 = scmp.eq.s32.totalorder %s158_s7, 0  ;;  %s1169_s15 = sshll.u32 %s221_s17, 7 }
  0x40   : > { %s1183_s16 = sshll.u32 %s1729_s26, 11  ;;  %s2427_s1 = sadd.s32 1, %s1705_s20 }
  0x41   : > { %s1917_s21 = scalar_select %p159_p2, %s1705_s20, %s2427_s1  }
  0x42   : > { %s1922_s18 = scalar_lea.hbm %s2397_s3, %s1183_s16  ;;  %s225_s28 = scalar_lea.vmem [#allocation9], %s1169_s15 }
  0x43   : > { %s232_s30 = sshll.u32 %s225_s28, 4  ;;  %p1926_p4 = pnand %p1386_p13, %p1900_p0  ;;  %s1930_s30 = int_to_ptr.vmem [resolvable:$true] %s232_s30 }
  0x44   : > { %s1932_s1 = scalar_lea.sflag [#allocation10], %s221_s17  ;;  %s1581_s10 = scalar_lea.hbm %s1922_s18, 2048 }
  0x45   : > { %p1582_p5 = scmp.ne.s32.totalorder %s1922_s18, %s1581_s10  ;;  %p1583_p6 = pneg %p1926_p4 }
  0x46   : > { %s1586_s16 = scalar_lea.hbm %s2397_s3, 8192  ;;  %p1587_p12 = scmp.lt.u32.totalorder %s1922_s18, %s2397_s3 }
  0x47   : > { %p1584_p8 = pnand %p1583_p6, %p1582_p5  ;;  %p1588_p1 = scmp.lt.u32.totalorder %s1586_s16, %s1581_s10 }
  0x48   : > { %p1590_p7 = scmp.lt.u32.totalorder %s1581_s10, %s1922_s18 }
  0x49   : > { %p1585_p10 = pneg %p1584_p8  ;;  %p1589_p3 = por %p1588_p1, %p1587_p12 }
  0x4b   : > { %p1591_p9 = por %p1590_p7, %p1589_p3 }
  0x4d   : > { %p1592_p11 = pnand %p1591_p9, %p1585_p10 }
  0x4f   : > { %1595 = shalt.err (!%p1592_p11)
}
  0x50   : > { %s1596_s17 = scalar_lea.vmem %s1930_s30, 2048  ;;  %s1742_s14 = smov [#allocation9]  }
  0x51   : > { %p1597_p0 = scmp.ne.s32.totalorder %s1930_s30, %s1596_s17  ;;  %s1601_s28 = sshll.u32 %s1742_s14, 4  ;;  %s1602_s28 = int_to_ptr.vmem [resolvable:$false] %s1601_s28 }
  0x52   : > { %s1603_s15 = scalar_lea.vmem %s1602_s28, 4096  ;;  %p1604_p5 = scmp.lt.s32.totalorder %s1930_s30, %s1602_s28 }
  0x53   : > { %p1599_p13 = pnand %p1597_p0, %p1583_p6  ;;  %p1605_p8 = scmp.lt.s32.totalorder %s1603_s15, %s1596_s17 }
  0x55   : > { %p1600_p2 = pneg %p1599_p13  ;;  %p1606_p12 = por %p1605_p8, %p1604_p5 }
  0x57   : > { %p1607_p1 = pnand %p1606_p12, %p1600_p2 }
  0x59   : > { %1610 = shalt.err (!%p1607_p1)
}
  0x5a   : > { %s2429_s10 = smov 8   ;;  %s2430_s16 = smov 128  }
  0x5b   : > { %1380 = dma.hbm_to_vmem [thread:$0]  (!%p1926_p4), %s1922_s18, 2048, %s1930_s30, %s1932_s1, %s2430_s16, %s2430_s16, %s2429_s10  }
  0x5c   : > { %p2431_p6 = scmp.ne.s32.totalorder %s2421_s11, 0 }
  0x5d   : > { %p2432_p10 = scmp.ne.s32.totalorder (!%p2431_p6), %s2416_s6, 0 }
  0x5e   : > { %250 = sbr.rel (%p2431_p6) target bundleno = 759 (0x2f7), region = 40 }
  0x65   : > { %1684 = dma.done.wait (%p2432_p10), [#allocation7], 2048  }
  0x66   : > { %1686 = vsyncadd (%p2432_p10), [#allocation7], 4294965248  ;;  %s256_s13 = sand.u32 1, %s1713_s22   ;;  %p2433_p3 = scmp.ne.s32.totalorder %s2417_s8, 0 }
  0x67   : > { %s1174_s29 = sshll.u32 %s256_s13, 7  ;;  %s257_s7 = scalar_lea.sflag [#allocation10], %s256_s13 }
  0x68   : > { %s1970_s17 = scalar_lea.vmem [#allocation9], %s1174_s29 }
  0x69   : > { %1688 = dma.done.wait (%p2433_p3), %s257_s7, 2048  }
  0x6a   : > { %1690 = vsyncadd (%p2433_p3), %s257_s7, 4294965248  ;;  %s291_s18 = sand.u32 1, %s1701_s19   ;;  %p293_p4 = scmp.lt.s32.totalorder %s1725_s25, 1 }
  0x6b   : > { %s1991_s10 = scalar_lea.vmem [#allocation11], %s291_s18  ;;  %p1176_p7 = scmp.ne.s32.totalorder %s1721_s24, 0 }
  0x6c   : > { %s1979_s6 = scalar_select %p293_p4, %s1725_s25, 1 }
  0x6d   : > { %304 = sbr.rel (%p1176_p7) target bundleno = 358 (0x166), region = 52  ;;  %v306_v1 = vld [vmem:[#allocation6] sm:$0xff] (!%p1176_p7)  ;;  %v307_v3 = vld [vmem:[#allocation6 + $0x8] sm:$0xff] (!%p1176_p7)  ;;  %v308_v5 = vld [vmem:[#allocation6 + $0x10] sm:$0xff] (!%p1176_p7)  ;;  %v1743_v7 = vmov (!%p1176_p7), 0   ;;  %vm596_vm0 = vcmask (!%p1176_p7), 57344  }
  0x6e   : > { %s1175_s11 = sshll.u32 %s1979_s6, 3  ;;  %s300_s14 = scalar_lea.vmem %s2398_s4, %s1979_s6  ;;  %v314_v2 = vld [vmem:[#allocation6 + $0x40] sm:$0xff] (!%p1176_p7)  ;;  %v315_v4 = vld [vmem:[#allocation6 + $0x48] sm:$0xff] (!%p1176_p7)  ;;  %1235 = vmatprep.mubr.f32.mxu0 (!%p1176_p7), %v306_v1  ;;  %v316_v6 = vld [vmem:[#allocation6 + $0x50] sm:$0xff] (!%p1176_p7)  ;;  %1484 = vset.pattern.permute.xlu1 (!%p1176_p7), %v1743_v7  ;;  %v1744_v34 = vmov (!%p1176_p7), -1e+30  }
  0x6f   : > { %s296_s8 = scalar_lea.vmem %s2394_s0, %s1175_s11  ;;  %1247 = vmatprep.mubr.f32.mxu1 (!%p1176_p7), %v314_v2  ;;  %1483 = vset.pattern.permute.xlu0 (!%p1176_p7), %v1743_v7  ;;  %v324_v8 = vld [vmem:[%s2396_s2 + $0x10] sm:$0xff] (!%p1176_p7)  ;;  %v309_v9 = vld [vmem:[#allocation6 + $0x18] sm:$0xff] (!%p1176_p7)  ;;  %v310_v12 = vld [vmem:[#allocation6 + $0x20] sm:$0xff] (!%p1176_p7)  ;;  %597 = vst.msk [vmem:[#allocation3] sm:$0x1] (!%p1176_p7), %vm596_vm0, %v1744_v34  ;;  %v1745_v35 = vmov (!%p1176_p7), 0.0  }
  0x70   : > { %v305_v0 = vld [vmem:[%s296_s8] sm:$0xff] (!%p1176_p7)  ;;  %350 = vperm.xlu1 (!%p1176_p7), %1484, %v324_v8   ;;  %v325_v14 = vld [vmem:[%s2396_s2 + $0x18] sm:$0xff] (!%p1176_p7)  ;;  %v323_v15 = vld [vmem:[%s2396_s2 + $0x8] sm:$0xff] (!%p1176_p7)  ;;  %598 = vst.msk [vmem:[#allocation4] sm:$0x1] (!%p1176_p7), %vm596_vm0, %v1745_v35  ;;  %vm579_vm1 = vcmask (!%p1176_p7), 64512  }
  0x71   : > { %1233 = vmatprep.subr.mxu0 (!%p1176_p7), %v305_v0  ;;  %1347 = vmatprep.subr.mxu1 (!%p1176_p7), %v305_v0  ;;  %v317_v10 = vld [vmem:[#allocation6 + $0x58] sm:$0xff] (!%p1176_p7)  ;;  %v318_v13 = vld [vmem:[#allocation6 + $0x60] sm:$0xff] (!%p1176_p7)  ;;  %v311_v16 = vld [vmem:[#allocation6 + $0x28] sm:$0xff] (!%p1176_p7)  ;;  %599 = vst.msk [vmem:[#allocation5] sm:$0x1] (!%p1176_p7), %vm596_vm0, %v1745_v35 }
  0x72   : > { %1234 = vmatpush3.xpose.msra.mxu0 (!%p1176_p7), %v305_v0  ;;  %1348 = vmatpush3.xpose.msra.mxu1 (!%p1176_p7), %v305_v0  ;;  %v322_v11 = vld [vmem:[%s2396_s2] sm:$0xff] (!%p1176_p7)  ;;  %v319_v17 = vld [vmem:[#allocation6 + $0x68] sm:$0xff] (!%p1176_p7)  ;;  %v312_v18 = vld [vmem:[#allocation6 + $0x30] sm:$0xff] (!%p1176_p7) }
  0x73   : > { %340 = vperm.xlu0 (!%p1176_p7), %1483, %v322_v11   ;;  %v320_v19 = vld [vmem:[#allocation6 + $0x70] sm:$0xff] (!%p1176_p7)  ;;  %v327_v20 = vld [vmem:[%s2396_s2 + $0x28] sm:$0xff] (!%p1176_p7)  ;;  %v326_v21 = vld [vmem:[%s2396_s2 + $0x20] sm:$0xff] (!%p1176_p7) }
  0x74   : > { %355 = vperm.xlu1 %1484, %v325_v14   ;;  %v313_v22 = vld [vmem:[#allocation6 + $0x38] sm:$0xff]  ;;  %v328_v25 = vld [vmem:[%s2396_s2 + $0x30] sm:$0xff]  ;;  %v331_v26 = vld [vmem:[%s2396_s2 + $0x48] sm:$0xff] }
  0x75   : > { %1236 = vmatmul.mubr.f32.vlgmr.msra.gmra.mrb[0].mxu0 %v307_v3  ;;  %1248 = vmatmul.mubr.f32.vlgmr.msra.gmra.mrb[0].mxu1 %v315_v4  ;;  %v321_v23 = vld [vmem:[#allocation6 + $0x78] sm:$0xff]  ;;  %v332_v29 = vld [vmem:[%s2396_s2 + $0x50] sm:$0xff]  ;;  %v335_v30 = vld [vmem:[%s2396_s2 + $0x68] sm:$0xff] }
  0x76   : > { %1238 = vmatprep.mubr.f32.mxu0 %v308_v5  ;;  %1250 = vmatprep.mubr.f32.mxu1 %v316_v6  ;;  %v329_v24 = vld [vmem:[%s2396_s2 + $0x38] sm:$0xff]  ;;  %v330_v27 = vld [vmem:[%s2396_s2 + $0x40] sm:$0xff]  ;;  %v336_v33 = vld [vmem:[%s2396_s2 + $0x70] sm:$0xff] }
  0x77   : > { %345 = vperm.xlu0 %1483, %v323_v15   ;;  %v333_v28 = vld [vmem:[%s2396_s2 + $0x58] sm:$0xff]  ;;  %v334_v31 = vld [vmem:[%s2396_s2 + $0x60] sm:$0xff] }
  0x78   : > { %365 = vperm.xlu1 %1484, %v327_v20   ;;  %v337_v32 = vld [vmem:[%s2396_s2 + $0x78] sm:$0xff] }
  0x79   : > { %1239 = vmatmul.mubr.f32.gmra.mrb[2].mxu0 %v309_v9  ;;  %1251 = vmatmul.mubr.f32.gmra.mrb[2].mxu1 %v317_v10 }
  0x7a   : > { %1241 = vmatprep.mubr.f32.mxu0 %v310_v12  ;;  %1253 = vmatprep.mubr.f32.mxu1 %v318_v13 }
  0x7b   : > { %360 = vperm.xlu0 %1483, %v326_v21  }
  0x7c   : > { %375 = vperm.xlu1 %1484, %v329_v24  }
  0x7d   : > { %1242 = vmatmul.mubr.f32.gmra.mrb[4].mxu0 %v311_v16  ;;  %1254 = vmatmul.mubr.f32.gmra.mrb[4].mxu1 %v319_v17 }
  0x7e   : > { %1244 = vmatprep.mubr.f32.mxu0 %v312_v18  ;;  %1256 = vmatprep.mubr.f32.mxu1 %v320_v19 }
  0x7f   : > { %370 = vperm.xlu0 %1483, %v328_v25  }
  0x80   : > { %385 = vperm.xlu1 %1484, %v331_v26  }
  0x81   : > { %1245 = vmatmul.mubr.f32.gmra.mrb[6].mxu0 %v313_v22  ;;  %1257 = vmatmul.mubr.f32.gmra.mrb[6].mxu1 %v321_v23 }
  0x83   : > { %380 = vperm.xlu0 %1483, %v330_v27  }
  0x84   : > { %395 = vperm.xlu1 %1484, %v333_v28  }
  0x87   : > { %390 = vperm.xlu0 %1483, %v332_v29  }
  0x88   : > { %405 = vperm.xlu1 %1484, %v335_v30  }
  0x8b   : > { %400 = vperm.xlu0 %1483, %v334_v31  }
  0x8c   : > { %415 = vperm.xlu1 %1484, %v337_v32  }
  0x8f   : > { %410 = vperm.xlu0 %1483, %v336_v33  }
  0xef   : > { %v351_v36 = vpop.permute.xlu1 %350 }
  0xf2   : > { %v341_v37 = vpop.permute.xlu0 %340 }
  0xf3   : > { %v356_v38 = vpop.permute.xlu1 %355 }
  0xf6   : > { %v346_v39 = vpop.permute.xlu0 %345 }
  0xf7   : > { %v366_v40 = vpop.permute.xlu1 %365 }
  0xfa   : > { %v361_v41 = vpop.permute.xlu0 %360 }
  0xfb   : > { %v376_v42 = vpop.permute.xlu1 %375 }
  0xfe   : > { %v371_v43 = vpop.permute.xlu0 %370 }
  0xff   : > { %v386_v44 = vpop.permute.xlu1 %385 }
 0x102   : > { %v381_v45 = vpop.permute.xlu0 %380 }
 0x103   : > { %v396_v46 = vpop.permute.xlu1 %395 }
 0x106   : > { %v391_v47 = vpop.permute.xlu0 %390 }
 0x107   : > { %v406_v56 = vpop.permute.xlu1 %405 }
 0x10a   : > { %v401_v57 = vpop.permute.xlu0 %400 }
 0x10b   : > { %v416_v10 = vpop.permute.xlu1 %415 }
 0x10e   : > { %v411_v11 = vpop.permute.xlu0 %410 }
 0x148   : > { %v1237_v48 = vpop.f32.mrb[0].mxu0  ;;  %v1249_v49 = vpop.f32.mrb[0].mxu1 }
 0x149   : > { %v490_v50 = vadd.f32 %v1237_v48, %v346_v39  ;;  %v530_v51 = vadd.f32 %v1249_v49, %v386_v44  ;;  %v484_v52 = vpop.f32.mrb[1].mxu0  ;;  %v524_v53 = vpop.f32.mrb[1].mxu1 }
 0x14a   : > { %v485_v54 = vadd.f32 %v484_v52, %v341_v37  ;;  %v525_v55 = vadd.f32 %v524_v53, %v381_v45 }
 0x14b   : > { %1485 = vtanh.f32 %v490_v50 }
 0x14c   : > { %1487 = vtanh.f32 %v530_v51  ;;  %v1240_v58 = vpop.f32.mrb[2].mxu0  ;;  %v1252_v59 = vpop.f32.mrb[2].mxu1 }
 0x14d   : > { %1489 = vtanh.f32 %v485_v54  ;;  %v500_v60 = vadd.f32 %v1240_v58, %v356_v38  ;;  %v540_v61 = vadd.f32 %v1252_v59, %v396_v46  ;;  %v494_v62 = vpop.f32.mrb[3].mxu0  ;;  %v534_v63 = vpop.f32.mrb[3].mxu1 }
 0x14e   : > { %1491 = vtanh.f32 %v525_v55  ;;  %v495_v0 = vadd.f32 %v494_v62, %v351_v36  ;;  %v535_v1 = vadd.f32 %v534_v63, %v391_v47 }
 0x14f   : > { %1493 = vtanh.f32 %v500_v60 }
 0x150   : > { %1495 = vtanh.f32 %v540_v61  ;;  %v1243_v2 = vpop.f32.mrb[4].mxu0  ;;  %v1255_v3 = vpop.f32.mrb[4].mxu1 }
 0x151   : > { %1497 = vtanh.f32 %v495_v0  ;;  %v510_v4 = vadd.f32 %v1243_v2, %v366_v40  ;;  %v550_v5 = vadd.f32 %v1255_v3, %v406_v56  ;;  %v504_v6 = vpop.f32.mrb[5].mxu0  ;;  %v544_v7 = vpop.f32.mrb[5].mxu1 }
 0x152   : > { %1499 = vtanh.f32 %v535_v1  ;;  %v505_v8 = vadd.f32 %v504_v6, %v361_v41  ;;  %v545_v9 = vadd.f32 %v544_v7, %v401_v57 }
 0x153   : > { %1501 = vtanh.f32 %v510_v4 }
 0x154   : > { %1503 = vtanh.f32 %v550_v5  ;;  %v1246_v12 = vpop.f32.mrb[6].mxu0  ;;  %v1258_v13 = vpop.f32.mrb[6].mxu1 }
 0x155   : > { %v1486_v14 = vpop.eup %1485  ;;  %1505 = vtanh.f32 %v505_v8  ;;  %v520_v15 = vadd.f32 %v1246_v12, %v376_v42  ;;  %v560_v16 = vadd.f32 %v1258_v13, %v416_v10  ;;  %v514_v17 = vpop.f32.mrb[7].mxu0 }
 0x156   : > { %v554_v18 = vpop.f32.mrb[7].mxu1  ;;  %v1488_v19 = vpop.eup %1487  ;;  %581 = vst.msk [vmem:[#allocation2 + $0x8] sm:$0xff] %vm579_vm1, %v1486_v14  ;;  %1507 = vtanh.f32 %v545_v9  ;;  %v515_v20 = vadd.f32 %v514_v17, %v371_v43 }
 0x157   : > { %v555_v21 = vadd.f32 %v554_v18, %v411_v11  ;;  %v1490_v22 = vpop.eup %1489  ;;  %589 = vst.msk [vmem:[#allocation2 + $0x48] sm:$0xff] %vm579_vm1, %v1488_v19  ;;  %1509 = vtanh.f32 %v520_v15 }
 0x158   : > { %v1492_v23 = vpop.eup %1491  ;;  %580 = vst.msk [vmem:[#allocation2] sm:$0xff] %vm579_vm1, %v1490_v22  ;;  %1511 = vtanh.f32 %v560_v16 }
 0x159   : > { %v1494_v24 = vpop.eup %1493  ;;  %588 = vst.msk [vmem:[#allocation2 + $0x40] sm:$0xff] %vm579_vm1, %v1492_v23  ;;  %1513 = vtanh.f32 %v515_v20 }
 0x15a   : > { %v1496_v25 = vpop.eup %1495  ;;  %583 = vst.msk [vmem:[#allocation2 + $0x18] sm:$0xff] %vm579_vm1, %v1494_v24  ;;  %1515 = vtanh.f32 %v555_v21 }
 0x15b   : > { %v1498_v26 = vpop.eup %1497  ;;  %591 = vst.msk [vmem:[#allocation2 + $0x58] sm:$0xff] %vm579_vm1, %v1496_v25 }
 0x15c   : > { %v1500_v27 = vpop.eup %1499  ;;  %582 = vst.msk [vmem:[#allocation2 + $0x10] sm:$0xff] %vm579_vm1, %v1498_v26 }
 0x15d   : > { %v1502_v28 = vpop.eup %1501  ;;  %590 = vst.msk [vmem:[#allocation2 + $0x50] sm:$0xff] %vm579_vm1, %v1500_v27 }
 0x15e   : > { %v1504_v29 = vpop.eup %1503  ;;  %585 = vst.msk [vmem:[#allocation2 + $0x28] sm:$0xff] %vm579_vm1, %v1502_v28 }
 0x15f   : > { %v1506_v30 = vpop.eup %1505  ;;  %593 = vst.msk [vmem:[#allocation2 + $0x68] sm:$0xff] %vm579_vm1, %v1504_v29 }
 0x160   : > { %v1508_v31 = vpop.eup %1507  ;;  %584 = vst.msk [vmem:[#allocation2 + $0x20] sm:$0xff] %vm579_vm1, %v1506_v30 }
 0x161   : > { %v1510_v32 = vpop.eup %1509  ;;  %592 = vst.msk [vmem:[#allocation2 + $0x60] sm:$0xff] %vm579_vm1, %v1508_v31 }
 0x162   : > { %v1512_v33 = vpop.eup %1511  ;;  %587 = vst.msk [vmem:[#allocation2 + $0x38] sm:$0xff] %vm579_vm1, %v1510_v32 }
 0x163   : > { %v1514_v34 = vpop.eup %1513  ;;  %595 = vst.msk [vmem:[#allocation2 + $0x78] sm:$0xff] %vm579_vm1, %v1512_v33 }
 0x164   : > { %v1516_v35 = vpop.eup %1515  ;;  %586 = vst.msk [vmem:[#allocation2 + $0x30] sm:$0xff] %vm579_vm1, %v1514_v34 }
 0x165   : > { %594 = vst.msk [vmem:[#allocation2 + $0x70] sm:$0xff] %vm579_vm1, %v1516_v35 }
 0x166 PF: > { %v616_v36 = vld [vmem:[#allocation2] sm:$0xff]  ;;  %v617_v37 = vld [vmem:[#allocation2 + $0x8] sm:$0xff]  ;;  %v618_v38 = vld [vmem:[#allocation2 + $0x10] sm:$0xff]  ;;  %v777_v12 = vlaneseq  ;;  %s1177_s29 = sshll.u32 %s1721_s24, 7  ;;  %vm813_vm3 = vcmask 64512   ;;  %p1179_p9 = scmp.ne.s32.totalorder %s1721_s24, 3 }
 0x167   : > { %v1315_v39 = vpack.c.bf16 %v617_v37, %v616_v36  ;;  %v619_v40 = vld [vmem:[#allocation2 + $0x18] sm:$0xff]  ;;  %v620_v42 = vld [vmem:[#allocation2 + $0x20] sm:$0xff]  ;;  %v621_v43 = vld [vmem:[#allocation2 + $0x28] sm:$0xff]  ;;  %v2078_v15 = vstv %s1177_s29 }
 0x168   : > { %v1319_v41 = vpack.c.bf16 %v619_v40, %v618_v38  ;;  %v1323_v44 = vpack.c.bf16 %v621_v43, %v620_v42  ;;  %v600_v45 = vld [vmem:[%s1970_s17] sm:$0xff]  ;;  %v626_v53 = vld [vmem:[#allocation2 + $0x50] sm:$0xff]  ;;  %v627_v54 = vld [vmem:[#allocation2 + $0x58] sm:$0xff]  ;;  %v2074_v13 = vshrl.u32 %v777_v12, 7 }
 0x169   : > { %1316 = vmatprep.subr.bf16.mxu0 %v1315_v39  ;;  %1349 = vmatprep.subr.bf16.mxu1 %v1315_v39  ;;  %v623_v47 = vld [vmem:[#allocation2 + $0x38] sm:$0xff]  ;;  %v608_v48 = vld [vmem:[%s1970_s17 + $0x40] sm:$0xff]  ;;  %v1335_v55 = vpack.c.bf16 %v627_v54, %v626_v53  ;;  %v601_v62 = vld [vmem:[%s1970_s17 + $0x8] sm:$0xff] }
 0x16a   : > { %1318 = vmatpush3.bf16.msra.mxu0 %v1315_v39  ;;  %1357 = vmatpush3.bf16.msra.mxu1 %v1315_v39  ;;  %v624_v50 = vld [vmem:[#allocation2 + $0x40] sm:$0xff]  ;;  %v625_v51 = vld [vmem:[#allocation2 + $0x48] sm:$0xff]  ;;  %v631_v60 = vld [vmem:[#allocation2 + $0x78] sm:$0xff]  ;;  %v779_v14 = vadd.s32 8, %v2074_v13  ;;  %v781_v16 = vadd.s32 24, %v2074_v13  ;;  %v780_v18 = vadd.s32 16, %v2074_v13  ;;  %v796_v20 = vadd.s32 %v2078_v15, %v2074_v13 }
 0x16b   : > { %1320 = vmatprep.subr.bf16.mxu0 %v1319_v41  ;;  %1350 = vmatprep.subr.bf16.mxu1 %v1319_v41  ;;  %v622_v46 = vld [vmem:[#allocation2 + $0x30] sm:$0xff]  ;;  %v1331_v52 = vpack.c.bf16 %v625_v51, %v624_v50  ;;  %v628_v56 = vld [vmem:[#allocation2 + $0x60] sm:$0xff]  ;;  %v629_v57 = vld [vmem:[#allocation2 + $0x68] sm:$0xff]  ;;  %v786_v22 = vadd.s32 64, %v2074_v13  ;;  %v783_v23 = vadd.s32 40, %v2074_v13  ;;  %v782_v25 = vadd.s32 32, %v2074_v13 }
 0x16c   : > { %1291 = vmatprep.mubr.f32.mxu0 %v600_v45  ;;  %1303 = vmatprep.mubr.f32.mxu1 %v608_v48  ;;  %v1327_v49 = vpack.c.bf16 %v623_v47, %v622_v46  ;;  %v1339_v58 = vpack.c.bf16 %v629_v57, %v628_v56  ;;  %v630_v59 = vld [vmem:[#allocation2 + $0x70] sm:$0xff]  ;;  %v603_v2 = vld [vmem:[%s1970_s17 + $0x18] sm:$0xff]  ;;  %v604_v4 = vld [vmem:[%s1970_s17 + $0x20] sm:$0xff]  ;;  %v797_v17 = vadd.s32 %v2078_v15, %v779_v14  ;;  %v785_v26 = vadd.s32 56, %v2074_v13 }
 0x16d   : > { %v1343_v61 = vpack.c.bf16 %v631_v60, %v630_v59  ;;  %v609_v63 = vld [vmem:[%s1970_s17 + $0x48] sm:$0xff]  ;;  %v602_v0 = vld [vmem:[%s1970_s17 + $0x10] sm:$0xff]  ;;  %v611_v3 = vld [vmem:[%s1970_s17 + $0x58] sm:$0xff]  ;;  %v799_v21 = vadd.s32 %v2078_v15, %v781_v16  ;;  %v798_v24 = vadd.s32 %v2078_v15, %v780_v18  ;;  %v784_v27 = vadd.s32 48, %v2074_v13 }
 0x16e   : > { %1322 = vmatpush3.bf16.msra.mxu0 %v1319_v41  ;;  %1358 = vmatpush3.bf16.msra.mxu1 %v1319_v41  ;;  %v610_v1 = vld [vmem:[%s1970_s17 + $0x50] sm:$0xff]  ;;  %v612_v5 = vld [vmem:[%s1970_s17 + $0x60] sm:$0xff]  ;;  %v605_v6 = vld [vmem:[%s1970_s17 + $0x28] sm:$0xff]  ;;  %v787_v30 = vadd.s32 72, %v2074_v13  ;;  %v804_v31 = vadd.s32 %v2078_v15, %v786_v22  ;;  %v789_v35 = vadd.s32 88, %v2074_v13  ;;  %v801_v36 = vadd.s32 %v2078_v15, %v783_v23 }
 0x16f   : > { %1324 = vmatprep.subr.bf16.mxu0 %v1323_v44  ;;  %1351 = vmatprep.subr.bf16.mxu1 %v1323_v44  ;;  %v613_v7 = vld [vmem:[%s1970_s17 + $0x68] sm:$0xff]  ;;  %v606_v8 = vld [vmem:[%s1970_s17 + $0x30] sm:$0xff]  ;;  %v607_v10 = vld [vmem:[%s1970_s17 + $0x38] sm:$0xff]  ;;  %v788_v37 = vadd.s32 80, %v2074_v13  ;;  %v800_v40 = vadd.s32 %v2078_v15, %v782_v25  ;;  %v803_v42 = vadd.s32 %v2078_v15, %v785_v26  ;;  %v790_v43 = vadd.s32 96, %v2074_v13 }
 0x170   : > { %v614_v9 = vld [vmem:[%s1970_s17 + $0x70] sm:$0xff]  ;;  %v615_v11 = vld [vmem:[%s1970_s17 + $0x78] sm:$0xff]  ;;  %v2125_v46 = vadd.s32 %v2078_v15, %v787_v30  ;;  %v2135_v50 = vadd.s32 %v2078_v15, %v789_v35 }
 0x171   : > { %v2088_v19 = vld [vmem:[%s300_s14] ss:$0 sm:$0xff]  ;;  %v2156_v57 = vadd.s32 %v2078_v15, %v790_v43 }
 0x172   : > { %1326 = vmatpush3.bf16.msra.mxu0 %v1323_v44  ;;  %1359 = vmatpush3.bf16.msra.mxu1 %v1323_v44  ;;  %vm959_vm2 = vcmp.eq.s32.totalorder %v797_v17, %v2088_v19  ;;  %vm958_vm4 = vcmp.eq.s32.totalorder %v796_v20, %v2088_v19  ;;  %vm961_vm5 = vcmp.eq.s32.totalorder %v799_v21, %v2088_v19 }
 0x173   : > { %1328 = vmatprep.subr.bf16.mxu0 %v1327_v49  ;;  %1352 = vmatprep.subr.bf16.mxu1 %v1327_v49  ;;  %vm960_vm6 = vcmp.eq.s32.totalorder %v798_v24, %v2088_v19  ;;  %v802_v44 = vadd.s32 %v2078_v15, %v784_v27  ;;  %vm966_vm7 = vcmp.eq.s32.totalorder %v804_v31, %v2088_v19 }
 0x174   : > { %vm963_vm8 = vcmp.eq.s32.totalorder %v801_v36, %v2088_v19  ;;  %vm962_vm9 = vcmp.eq.s32.totalorder %v800_v40, %v2088_v19  ;;  %vm965_vm10 = vcmp.eq.s32.totalorder %v803_v42, %v2088_v19  ;;  %vm967_vm12 = vcmp.eq.s32.totalorder %v2125_v46, %v2088_v19 }
 0x175   : > { %vm964_vm11 = vcmp.eq.s32.totalorder %v802_v44, %v2088_v19  ;;  %vm969_vm14 = vcmp.eq.s32.totalorder %v2135_v50, %v2088_v19  ;;  %vm970_vm15 = vcmp.eq.s32.totalorder %v2156_v57, %v2088_v19 }
 0x176   : > { %1330 = vmatpush3.bf16.msra.mxu0 %v1327_v49  ;;  %1360 = vmatpush3.bf16.msra.mxu1 %v1327_v49 }
 0x177   : > { %1332 = vmatprep.subr.bf16.mxu0 %v1331_v52  ;;  %1353 = vmatprep.subr.bf16.mxu1 %v1331_v52 }
 0x17a   : > { %1334 = vmatpush3.bf16.msra.mxu0 %v1331_v52  ;;  %1361 = vmatpush3.bf16.msra.mxu1 %v1331_v52  ;;  %v2141_v52 = vadd.s32 %v2078_v15, %v788_v37 }
 0x17b   : > { %1336 = vmatprep.subr.bf16.mxu0 %v1335_v55  ;;  %1354 = vmatprep.subr.bf16.mxu1 %v1335_v55 }
 0x17c   : > { %vm968_vm13 = vcmp.eq.s32.totalorder %v2141_v52, %v2088_v19 }
 0x17e   : > { %1338 = vmatpush3.bf16.msra.mxu0 %v1335_v55  ;;  %1362 = vmatpush3.bf16.msra.mxu1 %v1335_v55  ;;  %v2151_v55 = vadd.s32 104, %v2074_v13 }
 0x17f   : > { %1340 = vmatprep.subr.bf16.mxu0 %v1339_v58  ;;  %1355 = vmatprep.subr.bf16.mxu1 %v1339_v58 }
 0x182   : > { %1342 = vmatpush3.bf16.msra.mxu0 %v1339_v58  ;;  %1363 = vmatpush3.bf16.msra.mxu1 %v1339_v58 }
 0x183   : > { %1344 = vmatprep.subr.bf16.mxu0 %v1343_v61  ;;  %1356 = vmatprep.subr.bf16.mxu1 %v1343_v61 }
 0x186   : > { %1346 = vmatpush3.bf16.msra.mxu0 %v1343_v61  ;;  %1364 = vmatpush3.bf16.msra.mxu1 %v1343_v61 }
 0x189   : > { %1292 = vmatmul.mubr.f32.vlgmr.msra.gmra.mrb[0].mxu0 %v601_v62  ;;  %1304 = vmatmul.mubr.f32.vlgmr.msra.gmra.mrb[0].mxu1 %v609_v63 }
 0x18a   : > { %1294 = vmatprep.mubr.f32.mxu0 %v602_v0  ;;  %1306 = vmatprep.mubr.f32.mxu1 %v610_v1 }
 0x18d   : > { %1295 = vmatmul.mubr.f32.gmra.mrb[2].mxu0 %v603_v2  ;;  %1307 = vmatmul.mubr.f32.gmra.mrb[2].mxu1 %v611_v3 }
 0x18e   : > { %1297 = vmatprep.mubr.f32.mxu0 %v604_v4  ;;  %1309 = vmatprep.mubr.f32.mxu1 %v612_v5 }
 0x191   : > { %1298 = vmatmul.mubr.f32.gmra.mrb[4].mxu0 %v605_v6  ;;  %1310 = vmatmul.mubr.f32.gmra.mrb[4].mxu1 %v613_v7 }
 0x192   : > { %1300 = vmatprep.mubr.f32.mxu0 %v606_v8  ;;  %1312 = vmatprep.mubr.f32.mxu1 %v614_v9 }
 0x195   : > { %1301 = vmatmul.mubr.f32.gmra.mrb[6].mxu0 %v607_v10  ;;  %1313 = vmatmul.mubr.f32.gmra.mrb[6].mxu1 %v615_v11 }
 0x25c   : > { %v2101_v28 = vpop.f32.mrb[0].mxu0  ;;  %v2103_v29 = vpop.f32.mrb[0].mxu1 }
 0x25d   : > { %v975_v32 = vsel %vm959_vm2, %v2101_v28, 0.0  ;;  %v2109_v33 = vpop.f32.mrb[1].mxu0  ;;  %v2111_v34 = vpop.f32.mrb[1].mxu1  ;;  %v815_v58 = vsel %vm813_vm3, %v2101_v28, -inf  ;;  %v828_v60 = vsel %vm813_vm3, %v2103_v29, -inf }
 0x25e   : > { %v991_v38 = vsel %vm813_vm3, %v975_v32, 0.0  ;;  %v974_v39 = vsel %vm958_vm4, %v2109_v33, 0.0  ;;  %v814_v59 = vsel %vm813_vm3, %v2109_v33, -inf  ;;  %v826_v1 = vsel %vm813_vm3, %v2111_v34, -inf }
 0x25f   : > { %v990_v41 = vsel %vm813_vm3, %v974_v39, 0.0  ;;  %v982_v2 = vsel %vm966_vm7, %v2111_v34, 0.0  ;;  %vm949_vm4 = vcmask 57344  }
 0x260   : > { %v992_v45 = vadd.f32 %v991_v38, %v990_v41  ;;  %v2127_v47 = vpop.f32.mrb[2].mxu0  ;;  %v2129_v48 = vpop.f32.mrb[2].mxu1 }
 0x261   : > { %v2132_v49 = vpop.f32.mrb[3].mxu0  ;;  %v2138_v51 = vpop.f32.mrb[3].mxu1  ;;  %v977_v53 = vsel %vm961_vm5, %v2127_v47, 0.0  ;;  %v817_v16 = vsel %vm813_vm3, %v2127_v47, -inf  ;;  %v832_v17 = vsel %vm813_vm3, %v2129_v48, -inf }
 0x262   : > { %v976_v54 = vsel %vm960_vm6, %v2132_v49, 0.0  ;;  %v995_v0 = vsel %vm813_vm3, %v977_v53, 0.0  ;;  %v816_v23 = vsel %vm813_vm3, %v2132_v49, -inf  ;;  %v830_v42 = vsel %vm813_vm3, %v2138_v51, -inf }
 0x263   : > { %v993_v56 = vsel %vm813_vm3, %v976_v54, 0.0 }
 0x264   : > { %v994_v61 = vadd.f32 %v993_v56, %v992_v45  ;;  %v2167_v62 = vpop.f32.mrb[4].mxu0  ;;  %v2169_v63 = vpop.f32.mrb[4].mxu1 }
 0x265   : > { %v820_v3 = vsel %vm813_vm3, %v2167_v62, -inf  ;;  %v2179_v4 = vpop.f32.mrb[5].mxu0  ;;  %v2181_v5 = vpop.f32.mrb[5].mxu1  ;;  %v979_v7 = vsel %vm963_vm8, %v2167_v62, 0.0  ;;  %v836_v14 = vsel %vm813_vm3, %v2169_v63, -inf }
 0x266   : > { %v821_v6 = vmax.f32 %v815_v58, %v820_v3  ;;  %v818_v8 = vsel %vm813_vm3, %v2179_v4, -inf  ;;  %v978_v9 = vsel %vm962_vm9, %v2179_v4, 0.0  ;;  %v996_v11 = vadd.f32 %v995_v0, %v994_v61 }
 0x267   : > { %v819_v10 = vmax.f32 %v814_v59, %v818_v8  ;;  %v997_v12 = vsel %vm813_vm3, %v978_v9, 0.0  ;;  %v834_v21 = vsel %vm813_vm3, %v2181_v5, -inf  ;;  %v999_v31 = vsel %vm813_vm3, %v979_v7, 0.0 }
 0x268   : > { %v829_v18 = vmax.f32 %v821_v6, %v828_v60  ;;  %v2200_v20 = vpop.f32.mrb[6].mxu0  ;;  %v2204_v22 = vpop.f32.mrb[6].mxu1  ;;  %v998_v24 = vadd.f32 %v997_v12, %v996_v11  ;;  %v792_v60 = vadd.s32 112, %v2074_v13  ;;  %v983_v0 = vsel %vm967_vm12, %v2103_v29, 0.0 }
 0x269   : > { %v824_v25 = vsel %vm813_vm3, %v2200_v20, -inf  ;;  %v827_v26 = vmax.f32 %v819_v10, %v826_v1  ;;  %v2210_v27 = vpop.f32.mrb[7].mxu0  ;;  %v2212_v30 = vpop.f32.mrb[7].mxu1  ;;  %v981_v36 = vsel %vm965_vm10, %v2200_v20, 0.0  ;;  %v840_v53 = vsel %vm813_vm3, %v2204_v22, -inf }
 0x26a   : > { %v837_v32 = vmax.f32 %v829_v18, %v836_v14  ;;  %v825_v35 = vmax.f32 %v817_v16, %v824_v25  ;;  %v822_v38 = vsel %vm813_vm3, %v2210_v27, -inf  ;;  %v980_v39 = vsel %vm964_vm11, %v2210_v27, 0.0 }
 0x26b   : > { %v835_v37 = vmax.f32 %v827_v26, %v834_v21  ;;  %v1000_v40 = vadd.f32 %v999_v31, %v998_v24  ;;  %v823_v41 = vmax.f32 %v816_v23, %v822_v38  ;;  %v1001_v43 = vsel %vm813_vm3, %v980_v39, 0.0 }
 0x26c   : > { %v833_v45 = vmax.f32 %v825_v35, %v832_v17  ;;  %v838_v58 = vsel %vm813_vm3, %v2212_v30, -inf  ;;  %v1003_v59 = vsel %vm813_vm3, %v981_v36, 0.0  ;;  %v1005_v3 = vsel %vm813_vm3, %v982_v2, 0.0 }
 0x26d   : > { %v842_v54 = vmax.f32 %v835_v37, %v837_v32  ;;  %v1002_v56 = vadd.f32 %v1001_v43, %v1000_v40  ;;  %v831_v61 = vmax.f32 %v823_v41, %v830_v42  ;;  %v809_v6 = vadd.s32 %v2078_v15, %v2151_v55  ;;  %v2265_v43 = vld [vmem:[#allocation3] sm:$0x1] }
 0x26e   : > { %v841_v44 = vmax.f32 %v833_v45, %v840_v53  ;;  %v793_v7 = vadd.s32 120, %v2074_v13  ;;  %v984_v9 = vsel %vm968_vm13, %v2138_v51, 0.0  ;;  %v1007_v46 = vsel %vm813_vm3, %v983_v0, 0.0 }
 0x26f   : > { %v1004_v1 = vadd.f32 %v1003_v59, %v1002_v56  ;;  %v839_v8 = vmax.f32 %v831_v61, %v838_v58  ;;  %v810_v50 = vadd.s32 %v2078_v15, %v792_v60  ;;  %v985_v11 = vsel %vm969_vm14, %v2129_v48, 0.0 }
 0x270   : > { %v1009_v12 = vsel %vm813_vm3, %v984_v9, 0.0  ;;  %vm971_vm0 = vcmp.eq.s32.totalorder %v809_v6, %v2088_v19  ;;  %v811_v14 = vadd.s32 %v2078_v15, %v793_v7  ;;  %v986_v16 = vsel %vm970_vm15, %v2181_v5, 0.0 }
 0x271   : > { %v1006_v10 = vadd.f32 %v1005_v3, %v1004_v1  ;;  %v843_v2 = vmax.f32 %v839_v8, %v841_v44  ;;  %v1011_v18 = vsel %vm813_vm3, %v985_v11, 0.0  ;;  %vm972_vm1 = vcmp.eq.s32.totalorder %v810_v50, %v2088_v19 }
 0x272   : > { %v987_v57 = vsel %vm971_vm0, %v2169_v63, 0.0  ;;  %v1013_v24 = vsel %vm813_vm3, %v986_v16, 0.0  ;;  %vm973_vm2 = vcmp.eq.s32.totalorder %v811_v14, %v2088_v19  ;;  %v988_v26 = vsel %vm972_vm1, %v2212_v30, 0.0 }
 0x273   : > { %v1008_v55 = vadd.f32 %v1007_v46, %v1006_v10  ;;  %v844_v52 = vmax.f32 %v842_v54, %v843_v2  ;;  %v1015_v31 = vsel %vm813_vm3, %v987_v57, 0.0  ;;  %v989_v35 = vsel %vm973_vm2, %v2204_v22, 0.0  ;;  %v953_v10 = vld [vmem:[#allocation5] sm:$0x1] }
 0x274   : > { %v1017_v38 = vsel %vm813_vm3, %v988_v26, 0.0  ;;  %v1019_v40 = vsel %vm813_vm3, %v989_v35, 0.0  ;;  %v860_v53 = vsub.s32 0, %v2074_v13 }
 0x275   : > { %v1010_v17 = vadd.f32 %v1009_v12, %v1008_v55  ;;  %v845_v21 = vrot.slane %v844_v52, 4 }
 0x277   : > { %v1012_v23 = vadd.f32 %v1011_v18, %v1010_v17  ;;  %v846_v25 = vmax.f32 %v844_v52, %v845_v21 }
 0x279   : > { %v1014_v15 = vadd.f32 %v1013_v24, %v1012_v23  ;;  %v847_v32 = vrot.slane %v846_v25, 2 }
 0x27b   : > { %v1016_v36 = vadd.f32 %v1015_v31, %v1014_v15  ;;  %v848_v37 = vmax.f32 %v846_v25, %v847_v32 }
 0x27d   : > { %v1018_v39 = vadd.f32 %v1017_v38, %v1016_v36  ;;  %v849_v41 = vrot.slane %v848_v37, 1 }
 0x27f   : > { %v1020_v19 = vadd.f32 %v1019_v40, %v1018_v39  ;;  %v850_v45 = vmax.f32 %v848_v37, %v849_v41 }
 0x281   : > { %v1021_v42 = vrot.slane %v1020_v19, 4  ;;  %v2269_v54 = vmax.f32 %v2265_v43, %v850_v45 }
 0x283   : > { %v1022_v56 = vadd.f32 %v1021_v42, %v1020_v19  ;;  %v2272_v58 = vrot.slane %v2269_v54, %v860_v53  ;;  %951 = vst.msk [vmem:[#allocation3] sm:$0x1] %vm949_vm4, %v2269_v54 }
 0x285   : > { %v863_v59 = vsub.f32 %v2109_v33, %v2272_v58  ;;  %v864_v44 = vsub.f32 %v2101_v28, %v2272_v58  ;;  %v865_v13 = vsub.f32 %v2132_v49, %v2272_v58  ;;  %v1023_v60 = vrot.slane %v1022_v56, 2 }
 0x286   : > { %v866_v61 = vsub.f32 %v2127_v47, %v2272_v58  ;;  %v867_v0 = vsub.f32 %v2179_v4, %v2272_v58  ;;  %v868_v1 = vsub.f32 %v2167_v62, %v2272_v58  ;;  %v869_v3 = vsub.f32 %v2210_v27, %v2272_v58 }
 0x287   : > { %v870_v33 = vsub.f32 %v2200_v20, %v2272_v58  ;;  %v871_v28 = vsub.f32 %v2111_v34, %v2272_v58  ;;  %v872_v49 = vsub.f32 %v2103_v29, %v2272_v58  ;;  %v873_v47 = vsub.f32 %v2138_v51, %v2272_v58 }
 0x288   : > { %v874_v4 = vsub.f32 %v2129_v48, %v2272_v58  ;;  %v875_v62 = vsub.f32 %v2181_v5, %v2272_v58  ;;  %v876_v27 = vsub.f32 %v2169_v63, %v2272_v58  ;;  %v877_v20 = vsub.f32 %v2212_v30, %v2272_v58 }
 0x289   : > { %v878_v34 = vsub.f32 %v2204_v22, %v2272_v58  ;;  %v879_v6 = vmul.f32 1.442695, %v863_v59  ;;  %v881_v29 = vmul.f32 1.442695, %v864_v44  ;;  %v883_v7 = vmul.f32 1.442695, %v865_v13 }
 0x28a   : > { %v885_v8 = vmul.f32 1.442695, %v866_v61  ;;  %v1024_v51 = vadd.f32 %v1023_v60, %v1022_v56  ;;  %v887_v48 = vmul.f32 1.442695, %v867_v0  ;;  %v889_v5 = vmul.f32 1.442695, %v868_v1 }
 0x28b   : > { %1517 = vpow2.f32 %v879_v6  ;;  %v891_v63 = vmul.f32 1.442695, %v869_v3  ;;  %v893_v30 = vmul.f32 1.442695, %v870_v33  ;;  %v895_v22 = vmul.f32 1.442695, %v871_v28 }
 0x28c   : > { %1519 = vpow2.f32 %v881_v29  ;;  %v1025_v9 = vrot.slane %v1024_v51, 1  ;;  %v897_v55 = vmul.f32 1.442695, %v872_v49  ;;  %v899_v17 = vmul.f32 1.442695, %v873_v47 }
 0x28d   : > { %1521 = vpow2.f32 %v883_v7  ;;  %v901_v23 = vmul.f32 1.442695, %v874_v4  ;;  %v903_v15 = vmul.f32 1.442695, %v875_v62  ;;  %v905_v36 = vmul.f32 1.442695, %v876_v27 }
 0x28e   : > { %1523 = vpow2.f32 %v885_v8  ;;  %v1026_v46 = vadd.f32 %v1025_v9, %v1024_v51  ;;  %v907_v40 = vmul.f32 1.442695, %v877_v20  ;;  %v909_v53 = vmul.f32 1.442695, %v878_v34 }
 0x28f   : > { %1525 = vpow2.f32 %v887_v48  ;;  %v852_v49 = vsub.f32 %v2265_v43, %v2269_v54 }
 0x290   : > { %1527 = vpow2.f32 %v889_v5  ;;  %v1027_v50 = vadd.f32 %v1026_v46, %v953_v10 }
 0x291   : > { %1529 = vpow2.f32 %v891_v63  ;;  %v853_v6 = vmul.f32 1.442695, %v852_v49 }
 0x292   : > { %1028 = vst.msk [vmem:[#allocation5] sm:$0x1] %vm949_vm4, %v1027_v50  ;;  %1531 = vpow2.f32 %v893_v30  ;;  %v855_v30 = vld [vmem:[#allocation4] sm:$0x1] }
 0x293   : > { %1533 = vpow2.f32 %v895_v22 }
 0x294   : > { %1535 = vpow2.f32 %v897_v55 }
 0x295   : > { %v1518_v2 = vpop.eup %1517  ;;  %1537 = vpow2.f32 %v899_v17 }
 0x296   : > { %v1520_v11 = vpop.eup %1519  ;;  %v911_v12 = vsel %vm813_vm3, %v1518_v2, 0.0  ;;  %1539 = vpow2.f32 %v901_v23 }
 0x297   : > { %v1522_v14 = vpop.eup %1521  ;;  %v912_v52 = vsel %vm813_vm3, %v1520_v11, 0.0  ;;  %1541 = vpow2.f32 %v903_v15 }
 0x298   : > { %v1524_v16 = vpop.eup %1523  ;;  %v913_v18 = vadd.f32 %v912_v52, %v911_v12  ;;  %v914_v21 = vsel %vm813_vm3, %v1522_v14, 0.0  ;;  %1543 = vpow2.f32 %v905_v36  ;;  %v1033_v14 = vld [vmem:[#allocation3] sm:$0x1] (!%p1179_p9) }
 0x299   : > { %v1526_v57 = vpop.eup %1525  ;;  %v916_v25 = vsel %vm813_vm3, %v1524_v16, 0.0  ;;  %1545 = vpow2.f32 %v907_v40  ;;  %v1038_v16 = vld [vmem:[#allocation5] sm:$0x1] (!%p1179_p9) }
 0x29a   : > { %v915_v24 = vadd.f32 %v914_v21, %v913_v18  ;;  %v1528_v26 = vpop.eup %1527  ;;  %v918_v32 = vsel %vm813_vm3, %v1526_v57, 0.0  ;;  %1547 = vpow2.f32 %v909_v53 }
 0x29b   : > { %v1530_v35 = vpop.eup %1529  ;;  %v920_v38 = vsel %vm813_vm3, %v1528_v26, 0.0  ;;  %1549 = vpow2.f32 %v853_v6 }
 0x29c   : > { %v917_v31 = vadd.f32 %v916_v25, %v915_v24  ;;  %v1532_v39 = vpop.eup %1531  ;;  %v922_v19 = vsel %vm813_vm3, %v1530_v35, 0.0 }
 0x29d   : > { %v1534_v45 = vpop.eup %1533  ;;  %v924_v56 = vsel %vm813_vm3, %v1532_v39, 0.0 }
 0x29e   : > { %v919_v37 = vadd.f32 %v918_v32, %v917_v31  ;;  %v1536_v58 = vpop.eup %1535  ;;  %v926_v44 = vsel %vm813_vm3, %v1534_v45, 0.0 }
 0x29f   : > { %v1538_v13 = vpop.eup %1537  ;;  %v928_v61 = vsel %vm813_vm3, %v1536_v58, 0.0 }
 0x2a0   : > { %v921_v41 = vadd.f32 %v920_v38, %v919_v37  ;;  %v1540_v0 = vpop.eup %1539  ;;  %v930_v3 = vsel %vm813_vm3, %v1538_v13, 0.0 }
 0x2a1   : > { %v1542_v33 = vpop.eup %1541  ;;  %v932_v47 = vsel %vm813_vm3, %v1540_v0, 0.0 }
 0x2a2   : > { %v923_v42 = vadd.f32 %v922_v19, %v921_v41  ;;  %v1544_v4 = vpop.eup %1543  ;;  %v934_v27 = vsel %vm813_vm3, %v1542_v33, 0.0 }
 0x2a3   : > { %v1546_v20 = vpop.eup %1545  ;;  %v936_v29 = vsel %vm813_vm3, %v1544_v4, 0.0 }
 0x2a4   : > { %v925_v59 = vadd.f32 %v924_v56, %v923_v42  ;;  %v1548_v7 = vpop.eup %1547  ;;  %v938_v51 = vsel %vm813_vm3, %v1546_v20, 0.0 }
 0x2a5   : > { %v940_v5 = vsel %vm813_vm3, %v1548_v7, 0.0  ;;  %v1550_v46 = vpop.eup %1549 }
 0x2a6   : > { %v927_v60 = vadd.f32 %v926_v44, %v925_v59  ;;  %v856_v22 = vmul.f32 %v1550_v46, %v855_v30 }
 0x2a8   : > { %v929_v1 = vadd.f32 %v928_v61, %v927_v60 }
 0x2aa   : > { %v931_v28 = vadd.f32 %v930_v3, %v929_v1 }
 0x2ac   : > { %v933_v62 = vadd.f32 %v932_v47, %v931_v28 }
 0x2ae   : > { %v935_v34 = vadd.f32 %v934_v27, %v933_v62 }
 0x2b0   : > { %v937_v8 = vadd.f32 %v936_v29, %v935_v34 }
 0x2b2   : > { %v939_v48 = vadd.f32 %v938_v51, %v937_v8 }
 0x2b4   : > { %v941_v43 = vadd.f32 %v940_v5, %v939_v48 }
 0x2b6   : > { %v942_v54 = vrot.slane %v941_v43, 4 }
 0x2b8   : > { %v943_v9 = vadd.f32 %v942_v54, %v941_v43 }
 0x2ba   : > { %v944_v10 = vrot.slane %v943_v9, 2 }
 0x2bc   : > { %v945_v63 = vadd.f32 %v944_v10, %v943_v9 }
 0x2be   : > { %v946_v50 = vrot.slane %v945_v63, 1  ;;  %1032 = sbr.rel (%p1179_p9) target bundleno = 734 (0x2de), region = 56 }
 0x2c0   : > { %v947_v2 = vadd.f32 %v946_v50, %v945_v63 }
 0x2c2   : > { %v948_v11 = vadd.f32 %v947_v2, %v856_v22 }
 0x2c4   : > { %950 = vst.msk [vmem:[#allocation4] sm:$0x1] %vm949_vm4, %v948_v11 }
 0x2cb   : > { %v1034_v55 = vld [vmem:[#allocation4] sm:$0x1] }
 0x2cc   : > { %1551 = vlog2.f32 %v1034_v55 }
 0x2d6   : > { %v1552_v12 = vpop.eup %1551 }
 0x2d7   : > { %v1036_v52 = vmul.f32 0.6931472, %v1552_v12 }
 0x2d9   : > { %v1037_v17 = vadd.f32 %v1036_v52, %v1033_v14 }
 0x2db   : > { %v1039_v18 = vsub.f32 %v1037_v17, %v1038_v16 }
 0x2dd   : > { %1040 = vst.msk [vmem:[%s1991_s10] sm:$0x1] %vm949_vm4, %v1039_v18 }
 0x2de PF: > { %s1180_s17 = sshll.u32 %s1725_s25, 4  ;;  %s1054_s30 = sshll.u32 %s1991_s10, 4  ;;  %s1055_s30 = int_to_ptr.vmem [resolvable:$true] %s1054_s30 }
 0x2df   : > { %s2335_s14 = scalar_lea.hbm %s2399_s5, %s1180_s17  ;;  %s1042_s1 = scalar_lea.sflag [#allocation8], %s291_s18 }
 0x2e0   : > { %s1611_s28 = scalar_lea.vmem %s1055_s30, 16  ;;  %p2434_p0 = scmp.ne.s32.totalorder %s2418_s9, 0 }
 0x2e1   : > { %p1612_p11 = scmp.ne.s32.totalorder %s1055_s30, %s1611_s28  ;;  %s1746_s15 = smov [#allocation11]  }
 0x2e2   : > { %s1615_s8 = sshll.u32 %s1746_s15, 4  ;;  %s1616_s8 = int_to_ptr.vmem [resolvable:$false] %s1615_s8 }
 0x2e3   : > { %p1613_p13 = pnand %p1612_p11, %p2434_p0  ;;  %s1617_s16 = scalar_lea.vmem %s1616_s8, 32 }
 0x2e4   : > { %p1618_p5 = scmp.lt.s32.totalorder %s1055_s30, %s1616_s8  ;;  %p1619_p8 = scmp.lt.s32.totalorder %s1617_s16, %s1611_s28 }
 0x2e5   : > { %p1614_p2 = pneg %p1613_p13 }
 0x2e6   : > { %p1620_p12 = por %p1619_p8, %p1618_p5 }
 0x2e8   : > { %p1621_p1 = pnand %p1620_p12, %p1614_p2 }
 0x2ea   : > { %1624 = shalt.err (!%p1621_p1)
}
 0x2eb   : > { %s1625_s25 = scalar_lea.hbm %s2335_s14, 16  ;;  %s1629_s13 = scalar_lea.hbm %s2399_s5, 32 }
 0x2ec   : > { %p1626_p6 = scmp.ne.s32.totalorder %s2335_s14, %s1625_s25  ;;  %p1630_p4 = scmp.lt.u32.totalorder %s2335_s14, %s2399_s5 }
 0x2ed   : > { %p1631_p7 = scmp.lt.u32.totalorder %s1629_s13, %s1625_s25  ;;  %p1633_p11 = scmp.lt.u32.totalorder %s1625_s25, %s2335_s14 }
 0x2ee   : > { %p1627_p10 = pnand %p1626_p6, %p2434_p0 }
 0x2ef   : > { %p1632_p9 = por %p1631_p7, %p1630_p4 }
 0x2f0   : > { %p1628_p3 = pneg %p1627_p10 }
 0x2f1   : > { %p1634_p13 = por %p1633_p11, %p1632_p9 }
 0x2f3   : > { %p1635_p2 = pnand %p1634_p13, %p1628_p3 }
 0x2f5   : > { %1638 = shalt.err (!%p1635_p2)
}
 0x2f6   : > { %1371 = dma.vmem_to_hbm [thread:$0]  (%p2434_p0), %s1055_s30, 16, %s2335_s14, %s1042_s1  }
 0x2f7 PF: > { %s2435_s11 = sld [smem:[#allocation16_spill]]  ;;  %s2436_s17 = sld [smem:[#allocation15_spill]] }
 0x2f8   : > { %s2437_s6 = sld [smem:[#allocation17_spill]] }
 0x2fd   : > { %p1388_p5 = scmp.ge.s32.totalorder %s2435_s11, 2  ;;  %s1066_s24 = sand.u32 1, %s2436_s17  }
 0x2fe   : > { %p2438_p8 = scmp.ne.s32.totalorder %s2437_s6, 0  ;;  %s1067_s28 = scalar_lea.sflag [#allocation8], %s1066_s24 }
 0x300   : > { %p1382_p12 = pnand %p1388_p5, %p2438_p8 }
 0x302   : > { %1692 = dma.done.wait (!%p1382_p12), %s1067_s28, 16  }
 0x303   : > { %1694 = vsyncadd (!%p1382_p12), %s1067_s28, 4294967280  ;;  %s22_s28 = sadd.s32 1, %s2435_s11   ;;  %s2439_s9 = sld [smem:[#allocation18_spill]] }
 0x304   : > { %p19_p1 = scmp.ge.s32.totalorder %s22_s28, 10   ;;  %s2440_s14 = sld [smem:[#allocation19_spill]] }
 0x305   : > { %s2441_s18 = smov %s1701_s19  ;;  %s2442_s19 = smov %s1705_s20 }
 0x306   : > { %s2443_s20 = smov %s1917_s21  ;;  %s2444_s21 = smov %s1713_s22 }
 0x307   : > { %s2445_s22 = smov %s1717_s23  ;;  %s2446_s23 = smov %s1908_s12 }
 0x308   : > { %s2447_s24 = smov %s1729_s26  ;;  %s2448_s25 = smov %s1733_s27 }
 0x309   : > { %s2449_s26 = smov %s2439_s9  ;;  %21 = sbr.rel (!%p19_p1) target bundleno = 12 (0xc), region = 104 }
 0x30a   : > { %s2450_s27 = smov %s2440_s14 }
 0x310   :  { %1071 = vsyncpa [#allocation7], 1 }
 0x311   :  { %1073 = vsyncpa [#allocation7 + $0x1], 1 }
 0x312   :  { %1074 = vsyncpa [#allocation10], 1 }
 0x313   :  { %1076 = vsyncpa [#allocation10 + $0x1], 1 }
 0x314   :  { %1077 = vsyncpa [#allocation8], 1 }
 0x315   :  { %1079 = vsyncpa [#allocation8 + $0x1], 1 }

</bundles_post_ra>
